<compile_context>
chip_gen: v7x
topology: tpu7x:2x2x1
jax: 0.10.0
libtpu: 0.0.40
codegen_flags: <defaults>
</compile_context>

<pallas_src>
import jax
import jax.numpy as jnp
from jax.experimental import pallas as pl
from jax.experimental.pallas import tpu as pltpu

HIDDEN_SIZE = 32
FORECAST_SIZE = 4   # FORECAST_SIZE is an external constant in the source; fixed here.
LANE = 128          # lane-dense pad width for the final Linear output


def lstm_net_kernel(x_ref,
                    wih1_ref, b1_ref,
                    wf_ref, b2_ref,
                    wlin_ref, blin_ref,
                    out_ref):
    """2-layer LSTM over time + final Linear, one batch tile per grid step.

    x_ref    : (T, TB)     f32  input, time-major, feature dim squeezed in wrapper
    wih1_ref : (1, 4H)     f32  W_ih layer1, gate order (i,f,o,g), transposed
    b1_ref   : (1, 4H)     f32  b_ih1 + b_hh1, gate order (i,f,o,g)
    wf_ref   : (2H, 8H)    bf16 fused [[wih2.T, whh1.T],[whh2.T, 0]], gate order (i,f,o,g)
    b2_ref   : (1, 4H)     f32  b_ih2 + b_hh2, gate order (i,f,o,g)
    wlin_ref : (H, LANE)   f32  Linear weight, transposed, zero-padded to 128 lanes
    blin_ref : (1, LANE)   f32  Linear bias, zero-padded
    out_ref  : (TB, LANE)  f32  lane-dense output (wrapper slices [:, :F])
    """
    T, TB = x_ref.shape
    H4 = wih1_ref.shape[1]
    H = H4 // 4

    x = x_ref[...]                                  # (T, TB)
    wih1 = wih1_ref[...]                            # (1, 4H)
    b1 = b1_ref[...]                                # (1, 4H)
    wf = wf_ref[...]                                # (2H, 8H) bf16

    # Hoisted layer-1 input projection + bias for all timesteps (input_size == 1
    # => pure VPU broadcast).  Time-major layout: x_proj[t] is a zero-cost
    # outer-dim view per unrolled iteration.
    x_proj = x[:, :, None] * wih1[None, :, :] + b1[None, :, :]   # (T, TB, 4H)

    # Pre-broadcast b2 once (broadcasts are not CSE'd across unrolled iterations).
    b2 = jnp.broadcast_to(b2_ref[...], (TB, H4))

    def gates_to_hc(gates, c):
        # gate column order (i, f, o | g): one contiguous sigmoid region,
        # one contiguous tanh region.  All elementwise math stays f32.
        ifo = jax.nn.sigmoid(gates[:, : 3 * H])
        g = jnp.tanh(gates[:, 3 * H:])
        i = ifo[:, 0 * H:1 * H]
        f = ifo[:, 1 * H:2 * H]
        o = ifo[:, 2 * H:3 * H]
        c_new = f * c + i * g
        h_new = o * jnp.tanh(c_new)
        return h_new, c_new

    zeros = jnp.zeros((TB, H), jnp.float32)

    # t = 0 for layer 1: h1_{-1} = 0, so the recurrent term vanishes -> no matmul.
    h1, c1 = gates_to_hc(x_proj[0], zeros)
    h2, c2 = zeros, zeros

    # T is a small static constant -> fully unrolled.  One fused
    # (TB,2H)x(2H,8H) MXU push per step carries layer-2(t) gates AND the
    # recurrent contribution of layer-1(t+1).
    for t in range(T):
        hcat = jnp.concatenate([h1, h2], axis=1).astype(wf.dtype)     # (TB, 2H) bf16
        gf = jnp.dot(hcat, wf, preferred_element_type=jnp.float32)     # (TB, 8H) f32
        # Layer 2, step t (dropout(p=0.2) between layers: identity at inference).
        h2, c2 = gates_to_hc(gf[:, :H4] + b2, c2)
        # Layer 1, step t+1 (recurrent term already computed in the fused matmul).
        if t + 1 < T:
            h1, c1 = gates_to_hc(x_proj[t + 1] + gf[:, H4:], c1)

    # Final Linear on the last-timestep output of the top LSTM layer
    # (lane-dense padded weight -> one unmasked vreg store).
    out = jnp.dot(h2, wlin_ref[...], preferred_element_type=jnp.float32) + blin_ref[...]
    out_ref[...] = out.astype(out_ref.dtype)


def _round_up(n, m):
    return ((n + m - 1) // m) * m


def net_forward(x, packed):
    """x: (B, T, 1) or (B, T) float32. packed: dict from pack_params()."""
    if x.ndim == 3:
        x = x[..., 0]                               # (B, T)
    B, T = x.shape

    # Batch tile: fill MXU rows (latency of the serial recurrence is independent
    # of the row count).  TB is either the full (padded) batch or a multiple of
    # 128 so the (T, TB) x-block stays lane-aligned; B > 128 always yields >= 2
    # grid steps so v7x's 2 TensorCores both get work.
    B8 = _round_up(B, 8)
    if B8 <= 128:
        TB = B8
    elif B8 <= 512:
        TB = 128
    else:
        TB = 256
    B_pad = _round_up(B8, TB)
    grid = (B_pad // TB,)

    # Time-major, batch-padded input: every block is full (unmasked stores).
    xt = jnp.zeros((T, B_pad), jnp.float32).at[:, :B].set(x.T)

    def wspec(arr):
        return pl.BlockSpec(arr.shape, lambda b: (0, 0))

    out_padded = pl.pallas_call(
        lstm_net_kernel,
        out_shape=jax.ShapeDtypeStruct((B_pad, LANE), jnp.float32),
        grid=grid,
        in_specs=[
            pl.BlockSpec((T, TB), lambda b: (0, b)),       # x (time-major)
            wspec(packed["wih1"]),
            wspec(packed["b1"]),
            wspec(packed["w_fused"]),
            wspec(packed["b2"]),
            wspec(packed["wlin"]),
            wspec(packed["blin"]),
        ],
        out_specs=pl.BlockSpec((TB, LANE), lambda b: (b, 0)),
        compiler_params=pltpu.CompilerParams(
            dimension_semantics=("parallel",)),            # batch sharding (v7x 2-TC)
    )(xt, packed["wih1"], packed["b1"], packed["w_fused"],
      packed["b2"], packed["wlin"], packed["blin"])

    return out_padded[:B, :FORECAST_SIZE]


def init_params(key):
    """PyTorch-shaped raw weights, U(-1/sqrt(H), 1/sqrt(H)) init."""
    H = HIDDEN_SIZE
    F = FORECAST_SIZE
    bound = 1.0 / jnp.sqrt(jnp.float32(H))
    keys = jax.random.split(key, 12)

    def u(k, shape):
        return jax.random.uniform(k, shape, jnp.float32, -bound, bound)

    return {
        "wih1": u(keys[0], (4 * H, 1)),
        "whh1": u(keys[1], (4 * H, H)),
        "bih1": u(keys[2], (4 * H,)),
        "bhh1": u(keys[3], (4 * H,)),
        "wih2": u(keys[4], (4 * H, H)),
        "whh2": u(keys[5], (4 * H, H)),
        "bih2": u(keys[6], (4 * H,)),
        "bhh2": u(keys[7], (4 * H,)),
        "wlin": u(keys[8], (F, H)),
        "blin": u(keys[9], (F,)),
    }


def pack_params(raw):
    """Host-side packing: gate reorder (i,f,g,o)->(i,f,o,g), weight transpose,
    layer-1(t+1)/layer-2(t) recurrent weight fusion (bf16), bias fusion,
    lane-dense Linear padding."""
    H = HIDDEN_SIZE
    F = FORECAST_SIZE
    perm = jnp.concatenate([
        jnp.arange(0 * H, 1 * H),   # i
        jnp.arange(1 * H, 2 * H),   # f
        jnp.arange(3 * H, 4 * H),   # o
        jnp.arange(2 * H, 3 * H),   # g
    ])

    wih1 = raw["wih1"][perm].T                                   # (1, 4H)
    b1 = (raw["bih1"] + raw["bhh1"])[perm].reshape(1, 4 * H)     # (1, 4H)
    b2 = (raw["bih2"] + raw["bhh2"])[perm].reshape(1, 4 * H)     # (1, 4H)

    # Fused recurrent weight:  [h1_t | h2_{t-1}] @ W_fused
    #   lanes [0:4H)  -> layer-2 gates at step t      ([wih2.T ; whh2.T])
    #   lanes [4H:8H) -> layer-1 recurrent term, t+1  ([whh1.T ; 0])
    w2 = jnp.concatenate([raw["wih2"][perm].T,
                          raw["whh2"][perm].T], axis=0)          # (2H, 4H)
    whh1_blk = jnp.concatenate([raw["whh1"][perm].T,
                                jnp.zeros((H, 4 * H), jnp.float32)], axis=0)  # (2H, 4H)
    w_fused = jnp.concatenate([w2, whh1_blk], axis=1).astype(jnp.bfloat16)    # (2H, 8H)

    wlin = jnp.zeros((H, LANE), jnp.float32).at[:, :F].set(raw["wlin"].T)
    blin = jnp.zeros((1, LANE), jnp.float32).at[0, :F].set(raw["blin"])

    return {"wih1": wih1, "b1": b1, "w_fused": w_fused, "b2": b2,
            "wlin": wlin, "blin": blin}


def net_forward_ref(x, raw):
    """Pure-JAX f32 reference in original PyTorch layout/gate order (i,f,g,o)."""
    B, T, _ = x.shape
    H = HIDDEN_SIZE

    def cell(xt, h, c, wih, whh, bih, bhh):
        gates = xt @ wih.T + h @ whh.T + bih + bhh
        i = jax.nn.sigmoid(gates[:, 0 * H:1 * H])
        f = jax.nn.sigmoid(gates[:, 1 * H:2 * H])
        g = jnp.tanh(gates[:, 2 * H:3 * H])
        o = jax.nn.sigmoid(gates[:, 3 * H:4 * H])
        c = f * c + i * g
        return o * jnp.tanh(c), c

    h1 = c1 = h2 = c2 = jnp.zeros((B, H), jnp.float32)
    for t in range(T):
        xt = x[:, t, :]
        h1, c1 = cell(xt, h1, c1, raw["wih1"], raw["whh1"], raw["bih1"], raw["bhh1"])
        h2, c2 = cell(h1, h2, c2, raw["wih2"], raw["whh2"], raw["bih2"], raw["bhh2"])
    return h2 @ raw["wlin"].T + raw["blin"]


if __name__ == "__main__":
    key = jax.random.PRNGKey(0)
    k_param, k_x1, k_x2 = jax.random.split(key, 3)

    raw = init_params(k_param)
    packed = pack_params(raw)

    # bf16 matmul operands inside the kernel -> looser tolerance vs. f32 reference.
    TOL = dict(atol=2e-2, rtol=2e-2)

    # Small batch (padded 2 -> 8 rows, single grid step).
    B, T = 2, 8
    x = jax.random.normal(k_x1, (B, T, 1), jnp.float32)
    out = jax.block_until_ready(net_forward(x, packed))
    ref = net_forward_ref(x, raw)
    assert out.shape == (B, FORECAST_SIZE)
    assert jnp.allclose(out, ref, **TOL), (out, ref)

    # Non-multiple-of-8 batch (padded 10 -> 16 rows) exercises pad + slice path.
    B2 = 10
    x2 = jax.random.normal(k_x2, (B2, T, 1), jnp.float32)
    out2 = jax.block_until_ready(net_forward(x2, packed))
    ref2 = net_forward_ref(x2, raw)
    assert out2.shape == (B2, FORECAST_SIZE)
    assert jnp.allclose(out2, ref2, **TOL), (out2, ref2)

    print("KERNEL_OK")
</pallas_src>

<mosaic_0001>
module attributes {stable_mosaic.version = 11 : i64} {
  func.func @lstm_net_kernel(%arg0: i32, %arg1: memref<8x8xf32, #tpu.memory_space<vmem>>, %arg2: memref<1x128xf32, #tpu.memory_space<vmem>>, %arg3: memref<1x128xf32, #tpu.memory_space<vmem>>, %arg4: memref<64x256xbf16, #tpu.memory_space<vmem>>, %arg5: memref<1x128xf32, #tpu.memory_space<vmem>>, %arg6: memref<32x128xf32, #tpu.memory_space<vmem>>, %arg7: memref<1x128xf32, #tpu.memory_space<vmem>>, %arg8: memref<8x128xf32, #tpu.memory_space<vmem>>) attributes {dimension_semantics = [#tpu.dimension_semantics<parallel>], iteration_bounds = array<i64: 1>, scalar_prefetch = 0 : i64, scratch_operands = 0 : i64, tpu.core_type = #tpu.core_type<tc>, window_params = [{transform_indices = @transform_0, window_bounds = array<i64: 8, 8>}, {pipeline_mode = #tpu.pipeline_mode<synchronous>, transform_indices = @transform_1, window_bounds = array<i64: 1, 128>}, {pipeline_mode = #tpu.pipeline_mode<synchronous>, transform_indices = @transform_2, window_bounds = array<i64: 1, 128>}, {pipeline_mode = #tpu.pipeline_mode<synchronous>, transform_indices = @transform_3, window_bounds = array<i64: 64, 256>}, {pipeline_mode = #tpu.pipeline_mode<synchronous>, transform_indices = @transform_4, window_bounds = array<i64: 1, 128>}, {pipeline_mode = #tpu.pipeline_mode<synchronous>, transform_indices = @transform_5, window_bounds = array<i64: 32, 128>}, {pipeline_mode = #tpu.pipeline_mode<synchronous>, transform_indices = @transform_6, window_bounds = array<i64: 1, 128>}, {transform_indices = @transform_7, window_bounds = array<i64: 8, 128>}]} {
    %c0 = arith.constant 0 : index
    %c0_0 = arith.constant 0 : index
    %0 = vector.load %arg1[%c0, %c0_0] : memref<8x8xf32, #tpu.memory_space<vmem>>, vector<8x8xf32>
    %c0_1 = arith.constant 0 : index
    %c0_2 = arith.constant 0 : index
    %1 = vector.load %arg2[%c0_1, %c0_2] : memref<1x128xf32, #tpu.memory_space<vmem>>, vector<1x128xf32>
    %c0_3 = arith.constant 0 : index
    %c0_4 = arith.constant 0 : index
    %2 = vector.load %arg3[%c0_3, %c0_4] : memref<1x128xf32, #tpu.memory_space<vmem>>, vector<1x128xf32>
    %c0_5 = arith.constant 0 : index
    %c0_6 = arith.constant 0 : index
    %3 = vector.load %arg4[%c0_5, %c0_6] : memref<64x256xbf16, #tpu.memory_space<vmem>>, vector<64x256xbf16>
    %4 = vector.shape_cast %0 : vector<8x8xf32> to vector<8x8x1xf32>
    %5 = vector.shape_cast %1 : vector<1x128xf32> to vector<1x1x128xf32>
    %6 = vector.broadcast %4 : vector<8x8x1xf32> to vector<8x8x128xf32>
    %7 = vector.broadcast %5 : vector<1x1x128xf32> to vector<8x8x128xf32>
    %8 = arith.mulf %6, %7 : vector<8x8x128xf32>
    %9 = vector.shape_cast %2 : vector<1x128xf32> to vector<1x1x128xf32>
    %10 = vector.broadcast %9 : vector<1x1x128xf32> to vector<8x8x128xf32>
    %11 = arith.addf %8, %10 : vector<8x8x128xf32>
    %c0_7 = arith.constant 0 : index
    %c0_8 = arith.constant 0 : index
    %12 = vector.load %arg5[%c0_7, %c0_8] : memref<1x128xf32, #tpu.memory_space<vmem>>, vector<1x128xf32>
    %13 = vector.shape_cast %12 : vector<1x128xf32> to vector<1x128xf32>
    %14 = vector.broadcast %13 : vector<1x128xf32> to vector<8x128xf32>
    %cst = arith.constant 0.000000e+00 : f32
    %15 = vector.broadcast %cst : f32 to vector<8x32xf32>
    %16 = vector.extract_strided_slice %11 {offsets = [0, 0, 0], sizes = [1, 8, 128], strides = [1, 1, 1]} : vector<8x8x128xf32> to vector<1x8x128xf32>
    %17 = vector.shape_cast %16 : vector<1x8x128xf32> to vector<8x128xf32>
    %18 = vector.extract_strided_slice %17 {offsets = [0, 0], sizes = [8, 96], strides = [1, 1]} : vector<8x128xf32> to vector<8x96xf32>
    %19 = arith.negf %18 : vector<8x96xf32>
    %20 = math.exp %19 : vector<8x96xf32>
    %cst_9 = arith.constant 1.000000e+00 : f32
    %21 = vector.broadcast %cst_9 : f32 to vector<8x96xf32>
    %22 = arith.addf %21, %20 : vector<8x96xf32>
    %23 = arith.divf %21, %22 : vector<8x96xf32>
    %24 = vector.extract_strided_slice %17 {offsets = [0, 96], sizes = [8, 32], strides = [1, 1]} : vector<8x128xf32> to vector<8x32xf32>
    %25 = math.tanh %24 : vector<8x32xf32>
    %26 = vector.extract_strided_slice %23 {offsets = [0, 0], sizes = [8, 32], strides = [1, 1]} : vector<8x96xf32> to vector<8x32xf32>
    %27 = vector.extract_strided_slice %23 {offsets = [0, 32], sizes = [8, 32], strides = [1, 1]} : vector<8x96xf32> to vector<8x32xf32>
    %28 = vector.extract_strided_slice %23 {offsets = [0, 64], sizes = [8, 32], strides = [1, 1]} : vector<8x96xf32> to vector<8x32xf32>
    %29 = arith.mulf %27, %15 : vector<8x32xf32>
    %30 = arith.mulf %26, %25 : vector<8x32xf32>
    %31 = arith.addf %29, %30 : vector<8x32xf32>
    %32 = math.tanh %31 : vector<8x32xf32>
    %33 = arith.mulf %28, %32 : vector<8x32xf32>
    %34 = tpu.concatenate %33, %15 in 1 : vector<8x32xf32>, vector<8x32xf32> -> vector<8x64xf32>
    %35 = arith.truncf %34 : vector<8x64xf32> to vector<8x64xbf16>
    %cst_10 = arith.constant dense<0.000000e+00> : vector<8x256xf32>
    %36 = tpu.matmul %35, %3, %cst_10 {dimension_numbers = #tpu.dot_dimension_numbers<[1], [0], [0], [1], [0, 0, 1, 1], [], []>} : vector<8x64xbf16>, vector<64x256xbf16>, vector<8x256xf32> -> vector<8x256xf32>
    %37 = vector.extract_strided_slice %36 {offsets = [0, 0], sizes = [8, 128], strides = [1, 1]} : vector<8x256xf32> to vector<8x128xf32>
    %38 = arith.addf %37, %14 : vector<8x128xf32>
    %39 = vector.extract_strided_slice %38 {offsets = [0, 0], sizes = [8, 96], strides = [1, 1]} : vector<8x128xf32> to vector<8x96xf32>
    %40 = arith.negf %39 : vector<8x96xf32>
    %41 = math.exp %40 : vector<8x96xf32>
    %cst_11 = arith.constant 1.000000e+00 : f32
    %42 = vector.broadcast %cst_11 : f32 to vector<8x96xf32>
    %43 = arith.addf %42, %41 : vector<8x96xf32>
    %44 = arith.divf %42, %43 : vector<8x96xf32>
    %45 = vector.extract_strided_slice %38 {offsets = [0, 96], sizes = [8, 32], strides = [1, 1]} : vector<8x128xf32> to vector<8x32xf32>
    %46 = math.tanh %45 : vector<8x32xf32>
    %47 = vector.extract_strided_slice %44 {offsets = [0, 0], sizes = [8, 32], strides = [1, 1]} : vector<8x96xf32> to vector<8x32xf32>
    %48 = vector.extract_strided_slice %44 {offsets = [0, 32], sizes = [8, 32], strides = [1, 1]} : vector<8x96xf32> to vector<8x32xf32>
    %49 = vector.extract_strided_slice %44 {offsets = [0, 64], sizes = [8, 32], strides = [1, 1]} : vector<8x96xf32> to vector<8x32xf32>
    %50 = arith.mulf %48, %15 : vector<8x32xf32>
    %51 = arith.mulf %47, %46 : vector<8x32xf32>
    %52 = arith.addf %50, %51 : vector<8x32xf32>
    %53 = math.tanh %52 : vector<8x32xf32>
    %54 = arith.mulf %49, %53 : vector<8x32xf32>
    %55 = vector.extract_strided_slice %11 {offsets = [1, 0, 0], sizes = [1, 8, 128], strides = [1, 1, 1]} : vector<8x8x128xf32> to vector<1x8x128xf32>
    %56 = vector.shape_cast %55 : vector<1x8x128xf32> to vector<8x128xf32>
    %57 = vector.extract_strided_slice %36 {offsets = [0, 128], sizes = [8, 128], strides = [1, 1]} : vector<8x256xf32> to vector<8x128xf32>
    %58 = arith.addf %56, %57 : vector<8x128xf32>
    %59 = vector.extract_strided_slice %58 {offsets = [0, 0], sizes = [8, 96], strides = [1, 1]} : vector<8x128xf32> to vector<8x96xf32>
    %60 = arith.negf %59 : vector<8x96xf32>
    %61 = math.exp %60 : vector<8x96xf32>
    %cst_12 = arith.constant 1.000000e+00 : f32
    %62 = vector.broadcast %cst_12 : f32 to vector<8x96xf32>
    %63 = arith.addf %62, %61 : vector<8x96xf32>
    %64 = arith.divf %62, %63 : vector<8x96xf32>
    %65 = vector.extract_strided_slice %58 {offsets = [0, 96], sizes = [8, 32], strides = [1, 1]} : vector<8x128xf32> to vector<8x32xf32>
    %66 = math.tanh %65 : vector<8x32xf32>
    %67 = vector.extract_strided_slice %64 {offsets = [0, 0], sizes = [8, 32], strides = [1, 1]} : vector<8x96xf32> to vector<8x32xf32>
    %68 = vector.extract_strided_slice %64 {offsets = [0, 32], sizes = [8, 32], strides = [1, 1]} : vector<8x96xf32> to vector<8x32xf32>
    %69 = vector.extract_strided_slice %64 {offsets = [0, 64], sizes = [8, 32], strides = [1, 1]} : vector<8x96xf32> to vector<8x32xf32>
    %70 = arith.mulf %68, %31 : vector<8x32xf32>
    %71 = arith.mulf %67, %66 : vector<8x32xf32>
    %72 = arith.addf %70, %71 : vector<8x32xf32>
    %73 = math.tanh %72 : vector<8x32xf32>
    %74 = arith.mulf %69, %73 : vector<8x32xf32>
    %75 = tpu.concatenate %74, %54 in 1 : vector<8x32xf32>, vector<8x32xf32> -> vector<8x64xf32>
    %76 = arith.truncf %75 : vector<8x64xf32> to vector<8x64xbf16>
    %cst_13 = arith.constant dense<0.000000e+00> : vector<8x256xf32>
    %77 = tpu.matmul %76, %3, %cst_13 {dimension_numbers = #tpu.dot_dimension_numbers<[1], [0], [0], [1], [0, 0, 1, 1], [], []>} : vector<8x64xbf16>, vector<64x256xbf16>, vector<8x256xf32> -> vector<8x256xf32>
    %78 = vector.extract_strided_slice %77 {offsets = [0, 0], sizes = [8, 128], strides = [1, 1]} : vector<8x256xf32> to vector<8x128xf32>
    %79 = arith.addf %78, %14 : vector<8x128xf32>
    %80 = vector.extract_strided_slice %79 {offsets = [0, 0], sizes = [8, 96], strides = [1, 1]} : vector<8x128xf32> to vector<8x96xf32>
    %81 = arith.negf %80 : vector<8x96xf32>
    %82 = math.exp %81 : vector<8x96xf32>
    %cst_14 = arith.constant 1.000000e+00 : f32
    %83 = vector.broadcast %cst_14 : f32 to vector<8x96xf32>
    %84 = arith.addf %83, %82 : vector<8x96xf32>
    %85 = arith.divf %83, %84 : vector<8x96xf32>
    %86 = vector.extract_strided_slice %79 {offsets = [0, 96], sizes = [8, 32], strides = [1, 1]} : vector<8x128xf32> to vector<8x32xf32>
    %87 = math.tanh %86 : vector<8x32xf32>
    %88 = vector.extract_strided_slice %85 {offsets = [0, 0], sizes = [8, 32], strides = [1, 1]} : vector<8x96xf32> to vector<8x32xf32>
    %89 = vector.extract_strided_slice %85 {offsets = [0, 32], sizes = [8, 32], strides = [1, 1]} : vector<8x96xf32> to vector<8x32xf32>
    %90 = vector.extract_strided_slice %85 {offsets = [0, 64], sizes = [8, 32], strides = [1, 1]} : vector<8x96xf32> to vector<8x32xf32>
    %91 = arith.mulf %89, %52 : vector<8x32xf32>
    %92 = arith.mulf %88, %87 : vector<8x32xf32>
    %93 = arith.addf %91, %92 : vector<8x32xf32>
    %94 = math.tanh %93 : vector<8x32xf32>
    %95 = arith.mulf %90, %94 : vector<8x32xf32>
    %96 = vector.extract_strided_slice %11 {offsets = [2, 0, 0], sizes = [1, 8, 128], strides = [1, 1, 1]} : vector<8x8x128xf32> to vector<1x8x128xf32>
    %97 = vector.shape_cast %96 : vector<1x8x128xf32> to vector<8x128xf32>
    %98 = vector.extract_strided_slice %77 {offsets = [0, 128], sizes = [8, 128], strides = [1, 1]} : vector<8x256xf32> to vector<8x128xf32>
    %99 = arith.addf %97, %98 : vector<8x128xf32>
    %100 = vector.extract_strided_slice %99 {offsets = [0, 0], sizes = [8, 96], strides = [1, 1]} : vector<8x128xf32> to vector<8x96xf32>
    %101 = arith.negf %100 : vector<8x96xf32>
    %102 = math.exp %101 : vector<8x96xf32>
    %cst_15 = arith.constant 1.000000e+00 : f32
    %103 = vector.broadcast %cst_15 : f32 to vector<8x96xf32>
    %104 = arith.addf %103, %102 : vector<8x96xf32>
    %105 = arith.divf %103, %104 : vector<8x96xf32>
    %106 = vector.extract_strided_slice %99 {offsets = [0, 96], sizes = [8, 32], strides = [1, 1]} : vector<8x128xf32> to vector<8x32xf32>
    %107 = math.tanh %106 : vector<8x32xf32>
    %108 = vector.extract_strided_slice %105 {offsets = [0, 0], sizes = [8, 32], strides = [1, 1]} : vector<8x96xf32> to vector<8x32xf32>
    %109 = vector.extract_strided_slice %105 {offsets = [0, 32], sizes = [8, 32], strides = [1, 1]} : vector<8x96xf32> to vector<8x32xf32>
    %110 = vector.extract_strided_slice %105 {offsets = [0, 64], sizes = [8, 32], strides = [1, 1]} : vector<8x96xf32> to vector<8x32xf32>
    %111 = arith.mulf %109, %72 : vector<8x32xf32>
    %112 = arith.mulf %108, %107 : vector<8x32xf32>
    %113 = arith.addf %111, %112 : vector<8x32xf32>
    %114 = math.tanh %113 : vector<8x32xf32>
    %115 = arith.mulf %110, %114 : vector<8x32xf32>
    %116 = tpu.concatenate %115, %95 in 1 : vector<8x32xf32>, vector<8x32xf32> -> vector<8x64xf32>
    %117 = arith.truncf %116 : vector<8x64xf32> to vector<8x64xbf16>
    %cst_16 = arith.constant dense<0.000000e+00> : vector<8x256xf32>
    %118 = tpu.matmul %117, %3, %cst_16 {dimension_numbers = #tpu.dot_dimension_numbers<[1], [0], [0], [1], [0, 0, 1, 1], [], []>} : vector<8x64xbf16>, vector<64x256xbf16>, vector<8x256xf32> -> vector<8x256xf32>
    %119 = vector.extract_strided_slice %118 {offsets = [0, 0], sizes = [8, 128], strides = [1, 1]} : vector<8x256xf32> to vector<8x128xf32>
    %120 = arith.addf %119, %14 : vector<8x128xf32>
    %121 = vector.extract_strided_slice %120 {offsets = [0, 0], sizes = [8, 96], strides = [1, 1]} : vector<8x128xf32> to vector<8x96xf32>
    %122 = arith.negf %121 : vector<8x96xf32>
    %123 = math.exp %122 : vector<8x96xf32>
    %cst_17 = arith.constant 1.000000e+00 : f32
    %124 = vector.broadcast %cst_17 : f32 to vector<8x96xf32>
    %125 = arith.addf %124, %123 : vector<8x96xf32>
    %126 = arith.divf %124, %125 : vector<8x96xf32>
    %127 = vector.extract_strided_slice %120 {offsets = [0, 96], sizes = [8, 32], strides = [1, 1]} : vector<8x128xf32> to vector<8x32xf32>
    %128 = math.tanh %127 : vector<8x32xf32>
    %129 = vector.extract_strided_slice %126 {offsets = [0, 0], sizes = [8, 32], strides = [1, 1]} : vector<8x96xf32> to vector<8x32xf32>
    %130 = vector.extract_strided_slice %126 {offsets = [0, 32], sizes = [8, 32], strides = [1, 1]} : vector<8x96xf32> to vector<8x32xf32>
    %131 = vector.extract_strided_slice %126 {offsets = [0, 64], sizes = [8, 32], strides = [1, 1]} : vector<8x96xf32> to vector<8x32xf32>
    %132 = arith.mulf %130, %93 : vector<8x32xf32>
    %133 = arith.mulf %129, %128 : vector<8x32xf32>
    %134 = arith.addf %132, %133 : vector<8x32xf32>
    %135 = math.tanh %134 : vector<8x32xf32>
    %136 = arith.mulf %131, %135 : vector<8x32xf32>
    %137 = vector.extract_strided_slice %11 {offsets = [3, 0, 0], sizes = [1, 8, 128], strides = [1, 1, 1]} : vector<8x8x128xf32> to vector<1x8x128xf32>
    %138 = vector.shape_cast %137 : vector<1x8x128xf32> to vector<8x128xf32>
    %139 = vector.extract_strided_slice %118 {offsets = [0, 128], sizes = [8, 128], strides = [1, 1]} : vector<8x256xf32> to vector<8x128xf32>
    %140 = arith.addf %138, %139 : vector<8x128xf32>
    %141 = vector.extract_strided_slice %140 {offsets = [0, 0], sizes = [8, 96], strides = [1, 1]} : vector<8x128xf32> to vector<8x96xf32>
    %142 = arith.negf %141 : vector<8x96xf32>
    %143 = math.exp %142 : vector<8x96xf32>
    %cst_18 = arith.constant 1.000000e+00 : f32
    %144 = vector.broadcast %cst_18 : f32 to vector<8x96xf32>
    %145 = arith.addf %144, %143 : vector<8x96xf32>
    %146 = arith.divf %144, %145 : vector<8x96xf32>
    %147 = vector.extract_strided_slice %140 {offsets = [0, 96], sizes = [8, 32], strides = [1, 1]} : vector<8x128xf32> to vector<8x32xf32>
    %148 = math.tanh %147 : vector<8x32xf32>
    %149 = vector.extract_strided_slice %146 {offsets = [0, 0], sizes = [8, 32], strides = [1, 1]} : vector<8x96xf32> to vector<8x32xf32>
    %150 = vector.extract_strided_slice %146 {offsets = [0, 32], sizes = [8, 32], strides = [1, 1]} : vector<8x96xf32> to vector<8x32xf32>
    %151 = vector.extract_strided_slice %146 {offsets = [0, 64], sizes = [8, 32], strides = [1, 1]} : vector<8x96xf32> to vector<8x32xf32>
    %152 = arith.mulf %150, %113 : vector<8x32xf32>
    %153 = arith.mulf %149, %148 : vector<8x32xf32>
    %154 = arith.addf %152, %153 : vector<8x32xf32>
    %155 = math.tanh %154 : vector<8x32xf32>
    %156 = arith.mulf %151, %155 : vector<8x32xf32>
    %157 = tpu.concatenate %156, %136 in 1 : vector<8x32xf32>, vector<8x32xf32> -> vector<8x64xf32>
    %158 = arith.truncf %157 : vector<8x64xf32> to vector<8x64xbf16>
    %cst_19 = arith.constant dense<0.000000e+00> : vector<8x256xf32>
    %159 = tpu.matmul %158, %3, %cst_19 {dimension_numbers = #tpu.dot_dimension_numbers<[1], [0], [0], [1], [0, 0, 1, 1], [], []>} : vector<8x64xbf16>, vector<64x256xbf16>, vector<8x256xf32> -> vector<8x256xf32>
    %160 = vector.extract_strided_slice %159 {offsets = [0, 0], sizes = [8, 128], strides = [1, 1]} : vector<8x256xf32> to vector<8x128xf32>
    %161 = arith.addf %160, %14 : vector<8x128xf32>
    %162 = vector.extract_strided_slice %161 {offsets = [0, 0], sizes = [8, 96], strides = [1, 1]} : vector<8x128xf32> to vector<8x96xf32>
    %163 = arith.negf %162 : vector<8x96xf32>
    %164 = math.exp %163 : vector<8x96xf32>
    %cst_20 = arith.constant 1.000000e+00 : f32
    %165 = vector.broadcast %cst_20 : f32 to vector<8x96xf32>
    %166 = arith.addf %165, %164 : vector<8x96xf32>
    %167 = arith.divf %165, %166 : vector<8x96xf32>
    %168 = vector.extract_strided_slice %161 {offsets = [0, 96], sizes = [8, 32], strides = [1, 1]} : vector<8x128xf32> to vector<8x32xf32>
    %169 = math.tanh %168 : vector<8x32xf32>
    %170 = vector.extract_strided_slice %167 {offsets = [0, 0], sizes = [8, 32], strides = [1, 1]} : vector<8x96xf32> to vector<8x32xf32>
    %171 = vector.extract_strided_slice %167 {offsets = [0, 32], sizes = [8, 32], strides = [1, 1]} : vector<8x96xf32> to vector<8x32xf32>
    %172 = vector.extract_strided_slice %167 {offsets = [0, 64], sizes = [8, 32], strides = [1, 1]} : vector<8x96xf32> to vector<8x32xf32>
    %173 = arith.mulf %171, %134 : vector<8x32xf32>
    %174 = arith.mulf %170, %169 : vector<8x32xf32>
    %175 = arith.addf %173, %174 : vector<8x32xf32>
    %176 = math.tanh %175 : vector<8x32xf32>
    %177 = arith.mulf %172, %176 : vector<8x32xf32>
    %178 = vector.extract_strided_slice %11 {offsets = [4, 0, 0], sizes = [1, 8, 128], strides = [1, 1, 1]} : vector<8x8x128xf32> to vector<1x8x128xf32>
    %179 = vector.shape_cast %178 : vector<1x8x128xf32> to vector<8x128xf32>
    %180 = vector.extract_strided_slice %159 {offsets = [0, 128], sizes = [8, 128], strides = [1, 1]} : vector<8x256xf32> to vector<8x128xf32>
    %181 = arith.addf %179, %180 : vector<8x128xf32>
    %182 = vector.extract_strided_slice %181 {offsets = [0, 0], sizes = [8, 96], strides = [1, 1]} : vector<8x128xf32> to vector<8x96xf32>
    %183 = arith.negf %182 : vector<8x96xf32>
    %184 = math.exp %183 : vector<8x96xf32>
    %cst_21 = arith.constant 1.000000e+00 : f32
    %185 = vector.broadcast %cst_21 : f32 to vector<8x96xf32>
    %186 = arith.addf %185, %184 : vector<8x96xf32>
    %187 = arith.divf %185, %186 : vector<8x96xf32>
    %188 = vector.extract_strided_slice %181 {offsets = [0, 96], sizes = [8, 32], strides = [1, 1]} : vector<8x128xf32> to vector<8x32xf32>
    %189 = math.tanh %188 : vector<8x32xf32>
    %190 = vector.extract_strided_slice %187 {offsets = [0, 0], sizes = [8, 32], strides = [1, 1]} : vector<8x96xf32> to vector<8x32xf32>
    %191 = vector.extract_strided_slice %187 {offsets = [0, 32], sizes = [8, 32], strides = [1, 1]} : vector<8x96xf32> to vector<8x32xf32>
    %192 = vector.extract_strided_slice %187 {offsets = [0, 64], sizes = [8, 32], strides = [1, 1]} : vector<8x96xf32> to vector<8x32xf32>
    %193 = arith.mulf %191, %154 : vector<8x32xf32>
    %194 = arith.mulf %190, %189 : vector<8x32xf32>
    %195 = arith.addf %193, %194 : vector<8x32xf32>
    %196 = math.tanh %195 : vector<8x32xf32>
    %197 = arith.mulf %192, %196 : vector<8x32xf32>
    %198 = tpu.concatenate %197, %177 in 1 : vector<8x32xf32>, vector<8x32xf32> -> vector<8x64xf32>
    %199 = arith.truncf %198 : vector<8x64xf32> to vector<8x64xbf16>
    %cst_22 = arith.constant dense<0.000000e+00> : vector<8x256xf32>
    %200 = tpu.matmul %199, %3, %cst_22 {dimension_numbers = #tpu.dot_dimension_numbers<[1], [0], [0], [1], [0, 0, 1, 1], [], []>} : vector<8x64xbf16>, vector<64x256xbf16>, vector<8x256xf32> -> vector<8x256xf32>
    %201 = vector.extract_strided_slice %200 {offsets = [0, 0], sizes = [8, 128], strides = [1, 1]} : vector<8x256xf32> to vector<8x128xf32>
    %202 = arith.addf %201, %14 : vector<8x128xf32>
    %203 = vector.extract_strided_slice %202 {offsets = [0, 0], sizes = [8, 96], strides = [1, 1]} : vector<8x128xf32> to vector<8x96xf32>
    %204 = arith.negf %203 : vector<8x96xf32>
    %205 = math.exp %204 : vector<8x96xf32>
    %cst_23 = arith.constant 1.000000e+00 : f32
    %206 = vector.broadcast %cst_23 : f32 to vector<8x96xf32>
    %207 = arith.addf %206, %205 : vector<8x96xf32>
    %208 = arith.divf %206, %207 : vector<8x96xf32>
    %209 = vector.extract_strided_slice %202 {offsets = [0, 96], sizes = [8, 32], strides = [1, 1]} : vector<8x128xf32> to vector<8x32xf32>
    %210 = math.tanh %209 : vector<8x32xf32>
    %211 = vector.extract_strided_slice %208 {offsets = [0, 0], sizes = [8, 32], strides = [1, 1]} : vector<8x96xf32> to vector<8x32xf32>
    %212 = vector.extract_strided_slice %208 {offsets = [0, 32], sizes = [8, 32], strides = [1, 1]} : vector<8x96xf32> to vector<8x32xf32>
    %213 = vector.extract_strided_slice %208 {offsets = [0, 64], sizes = [8, 32], strides = [1, 1]} : vector<8x96xf32> to vector<8x32xf32>
    %214 = arith.mulf %212, %175 : vector<8x32xf32>
    %215 = arith.mulf %211, %210 : vector<8x32xf32>
    %216 = arith.addf %214, %215 : vector<8x32xf32>
    %217 = math.tanh %216 : vector<8x32xf32>
    %218 = arith.mulf %213, %217 : vector<8x32xf32>
    %219 = vector.extract_strided_slice %11 {offsets = [5, 0, 0], sizes = [1, 8, 128], strides = [1, 1, 1]} : vector<8x8x128xf32> to vector<1x8x128xf32>
    %220 = vector.shape_cast %219 : vector<1x8x128xf32> to vector<8x128xf32>
    %221 = vector.extract_strided_slice %200 {offsets = [0, 128], sizes = [8, 128], strides = [1, 1]} : vector<8x256xf32> to vector<8x128xf32>
    %222 = arith.addf %220, %221 : vector<8x128xf32>
    %223 = vector.extract_strided_slice %222 {offsets = [0, 0], sizes = [8, 96], strides = [1, 1]} : vector<8x128xf32> to vector<8x96xf32>
    %224 = arith.negf %223 : vector<8x96xf32>
    %225 = math.exp %224 : vector<8x96xf32>
    %cst_24 = arith.constant 1.000000e+00 : f32
    %226 = vector.broadcast %cst_24 : f32 to vector<8x96xf32>
    %227 = arith.addf %226, %225 : vector<8x96xf32>
    %228 = arith.divf %226, %227 : vector<8x96xf32>
    %229 = vector.extract_strided_slice %222 {offsets = [0, 96], sizes = [8, 32], strides = [1, 1]} : vector<8x128xf32> to vector<8x32xf32>
    %230 = math.tanh %229 : vector<8x32xf32>
    %231 = vector.extract_strided_slice %228 {offsets = [0, 0], sizes = [8, 32], strides = [1, 1]} : vector<8x96xf32> to vector<8x32xf32>
    %232 = vector.extract_strided_slice %228 {offsets = [0, 32], sizes = [8, 32], strides = [1, 1]} : vector<8x96xf32> to vector<8x32xf32>
    %233 = vector.extract_strided_slice %228 {offsets = [0, 64], sizes = [8, 32], strides = [1, 1]} : vector<8x96xf32> to vector<8x32xf32>
    %234 = arith.mulf %232, %195 : vector<8x32xf32>
    %235 = arith.mulf %231, %230 : vector<8x32xf32>
    %236 = arith.addf %234, %235 : vector<8x32xf32>
    %237 = math.tanh %236 : vector<8x32xf32>
    %238 = arith.mulf %233, %237 : vector<8x32xf32>
    %239 = tpu.concatenate %238, %218 in 1 : vector<8x32xf32>, vector<8x32xf32> -> vector<8x64xf32>
    %240 = arith.truncf %239 : vector<8x64xf32> to vector<8x64xbf16>
    %cst_25 = arith.constant dense<0.000000e+00> : vector<8x256xf32>
    %241 = tpu.matmul %240, %3, %cst_25 {dimension_numbers = #tpu.dot_dimension_numbers<[1], [0], [0], [1], [0, 0, 1, 1], [], []>} : vector<8x64xbf16>, vector<64x256xbf16>, vector<8x256xf32> -> vector<8x256xf32>
    %242 = vector.extract_strided_slice %241 {offsets = [0, 0], sizes = [8, 128], strides = [1, 1]} : vector<8x256xf32> to vector<8x128xf32>
    %243 = arith.addf %242, %14 : vector<8x128xf32>
    %244 = vector.extract_strided_slice %243 {offsets = [0, 0], sizes = [8, 96], strides = [1, 1]} : vector<8x128xf32> to vector<8x96xf32>
    %245 = arith.negf %244 : vector<8x96xf32>
    %246 = math.exp %245 : vector<8x96xf32>
    %cst_26 = arith.constant 1.000000e+00 : f32
    %247 = vector.broadcast %cst_26 : f32 to vector<8x96xf32>
    %248 = arith.addf %247, %246 : vector<8x96xf32>
    %249 = arith.divf %247, %248 : vector<8x96xf32>
    %250 = vector.extract_strided_slice %243 {offsets = [0, 96], sizes = [8, 32], strides = [1, 1]} : vector<8x128xf32> to vector<8x32xf32>
    %251 = math.tanh %250 : vector<8x32xf32>
    %252 = vector.extract_strided_slice %249 {offsets = [0, 0], sizes = [8, 32], strides = [1, 1]} : vector<8x96xf32> to vector<8x32xf32>
    %253 = vector.extract_strided_slice %249 {offsets = [0, 32], sizes = [8, 32], strides = [1, 1]} : vector<8x96xf32> to vector<8x32xf32>
    %254 = vector.extract_strided_slice %249 {offsets = [0, 64], sizes = [8, 32], strides = [1, 1]} : vector<8x96xf32> to vector<8x32xf32>
    %255 = arith.mulf %253, %216 : vector<8x32xf32>
    %256 = arith.mulf %252, %251 : vector<8x32xf32>
    %257 = arith.addf %255, %256 : vector<8x32xf32>
    %258 = math.tanh %257 : vector<8x32xf32>
    %259 = arith.mulf %254, %258 : vector<8x32xf32>
    %260 = vector.extract_strided_slice %11 {offsets = [6, 0, 0], sizes = [1, 8, 128], strides = [1, 1, 1]} : vector<8x8x128xf32> to vector<1x8x128xf32>
    %261 = vector.shape_cast %260 : vector<1x8x128xf32> to vector<8x128xf32>
    %262 = vector.extract_strided_slice %241 {offsets = [0, 128], sizes = [8, 128], strides = [1, 1]} : vector<8x256xf32> to vector<8x128xf32>
    %263 = arith.addf %261, %262 : vector<8x128xf32>
    %264 = vector.extract_strided_slice %263 {offsets = [0, 0], sizes = [8, 96], strides = [1, 1]} : vector<8x128xf32> to vector<8x96xf32>
    %265 = arith.negf %264 : vector<8x96xf32>
    %266 = math.exp %265 : vector<8x96xf32>
    %cst_27 = arith.constant 1.000000e+00 : f32
    %267 = vector.broadcast %cst_27 : f32 to vector<8x96xf32>
    %268 = arith.addf %267, %266 : vector<8x96xf32>
    %269 = arith.divf %267, %268 : vector<8x96xf32>
    %270 = vector.extract_strided_slice %263 {offsets = [0, 96], sizes = [8, 32], strides = [1, 1]} : vector<8x128xf32> to vector<8x32xf32>
    %271 = math.tanh %270 : vector<8x32xf32>
    %272 = vector.extract_strided_slice %269 {offsets = [0, 0], sizes = [8, 32], strides = [1, 1]} : vector<8x96xf32> to vector<8x32xf32>
    %273 = vector.extract_strided_slice %269 {offsets = [0, 32], sizes = [8, 32], strides = [1, 1]} : vector<8x96xf32> to vector<8x32xf32>
    %274 = vector.extract_strided_slice %269 {offsets = [0, 64], sizes = [8, 32], strides = [1, 1]} : vector<8x96xf32> to vector<8x32xf32>
    %275 = arith.mulf %273, %236 : vector<8x32xf32>
    %276 = arith.mulf %272, %271 : vector<8x32xf32>
    %277 = arith.addf %275, %276 : vector<8x32xf32>
    %278 = math.tanh %277 : vector<8x32xf32>
    %279 = arith.mulf %274, %278 : vector<8x32xf32>
    %280 = tpu.concatenate %279, %259 in 1 : vector<8x32xf32>, vector<8x32xf32> -> vector<8x64xf32>
    %281 = arith.truncf %280 : vector<8x64xf32> to vector<8x64xbf16>
    %cst_28 = arith.constant dense<0.000000e+00> : vector<8x256xf32>
    %282 = tpu.matmul %281, %3, %cst_28 {dimension_numbers = #tpu.dot_dimension_numbers<[1], [0], [0], [1], [0, 0, 1, 1], [], []>} : vector<8x64xbf16>, vector<64x256xbf16>, vector<8x256xf32> -> vector<8x256xf32>
    %283 = vector.extract_strided_slice %282 {offsets = [0, 0], sizes = [8, 128], strides = [1, 1]} : vector<8x256xf32> to vector<8x128xf32>
    %284 = arith.addf %283, %14 : vector<8x128xf32>
    %285 = vector.extract_strided_slice %284 {offsets = [0, 0], sizes = [8, 96], strides = [1, 1]} : vector<8x128xf32> to vector<8x96xf32>
    %286 = arith.negf %285 : vector<8x96xf32>
    %287 = math.exp %286 : vector<8x96xf32>
    %cst_29 = arith.constant 1.000000e+00 : f32
    %288 = vector.broadcast %cst_29 : f32 to vector<8x96xf32>
    %289 = arith.addf %288, %287 : vector<8x96xf32>
    %290 = arith.divf %288, %289 : vector<8x96xf32>
    %291 = vector.extract_strided_slice %284 {offsets = [0, 96], sizes = [8, 32], strides = [1, 1]} : vector<8x128xf32> to vector<8x32xf32>
    %292 = math.tanh %291 : vector<8x32xf32>
    %293 = vector.extract_strided_slice %290 {offsets = [0, 0], sizes = [8, 32], strides = [1, 1]} : vector<8x96xf32> to vector<8x32xf32>
    %294 = vector.extract_strided_slice %290 {offsets = [0, 32], sizes = [8, 32], strides = [1, 1]} : vector<8x96xf32> to vector<8x32xf32>
    %295 = vector.extract_strided_slice %290 {offsets = [0, 64], sizes = [8, 32], strides = [1, 1]} : vector<8x96xf32> to vector<8x32xf32>
    %296 = arith.mulf %294, %257 : vector<8x32xf32>
    %297 = arith.mulf %293, %292 : vector<8x32xf32>
    %298 = arith.addf %296, %297 : vector<8x32xf32>
    %299 = math.tanh %298 : vector<8x32xf32>
    %300 = arith.mulf %295, %299 : vector<8x32xf32>
    %301 = vector.extract_strided_slice %11 {offsets = [7, 0, 0], sizes = [1, 8, 128], strides = [1, 1, 1]} : vector<8x8x128xf32> to vector<1x8x128xf32>
    %302 = vector.shape_cast %301 : vector<1x8x128xf32> to vector<8x128xf32>
    %303 = vector.extract_strided_slice %282 {offsets = [0, 128], sizes = [8, 128], strides = [1, 1]} : vector<8x256xf32> to vector<8x128xf32>
    %304 = arith.addf %302, %303 : vector<8x128xf32>
    %305 = vector.extract_strided_slice %304 {offsets = [0, 0], sizes = [8, 96], strides = [1, 1]} : vector<8x128xf32> to vector<8x96xf32>
    %306 = arith.negf %305 : vector<8x96xf32>
    %307 = math.exp %306 : vector<8x96xf32>
    %cst_30 = arith.constant 1.000000e+00 : f32
    %308 = vector.broadcast %cst_30 : f32 to vector<8x96xf32>
    %309 = arith.addf %308, %307 : vector<8x96xf32>
    %310 = arith.divf %308, %309 : vector<8x96xf32>
    %311 = vector.extract_strided_slice %304 {offsets = [0, 96], sizes = [8, 32], strides = [1, 1]} : vector<8x128xf32> to vector<8x32xf32>
    %312 = math.tanh %311 : vector<8x32xf32>
    %313 = vector.extract_strided_slice %310 {offsets = [0, 0], sizes = [8, 32], strides = [1, 1]} : vector<8x96xf32> to vector<8x32xf32>
    %314 = vector.extract_strided_slice %310 {offsets = [0, 32], sizes = [8, 32], strides = [1, 1]} : vector<8x96xf32> to vector<8x32xf32>
    %315 = vector.extract_strided_slice %310 {offsets = [0, 64], sizes = [8, 32], strides = [1, 1]} : vector<8x96xf32> to vector<8x32xf32>
    %316 = arith.mulf %314, %277 : vector<8x32xf32>
    %317 = arith.mulf %313, %312 : vector<8x32xf32>
    %318 = arith.addf %316, %317 : vector<8x32xf32>
    %319 = math.tanh %318 : vector<8x32xf32>
    %320 = arith.mulf %315, %319 : vector<8x32xf32>
    %321 = tpu.concatenate %320, %300 in 1 : vector<8x32xf32>, vector<8x32xf32> -> vector<8x64xf32>
    %322 = arith.truncf %321 : vector<8x64xf32> to vector<8x64xbf16>
    %cst_31 = arith.constant dense<0.000000e+00> : vector<8x256xf32>
    %323 = tpu.matmul %322, %3, %cst_31 {dimension_numbers = #tpu.dot_dimension_numbers<[1], [0], [0], [1], [0, 0, 1, 1], [], []>} : vector<8x64xbf16>, vector<64x256xbf16>, vector<8x256xf32> -> vector<8x256xf32>
    %324 = vector.extract_strided_slice %323 {offsets = [0, 0], sizes = [8, 128], strides = [1, 1]} : vector<8x256xf32> to vector<8x128xf32>
    %325 = arith.addf %324, %14 : vector<8x128xf32>
    %326 = vector.extract_strided_slice %325 {offsets = [0, 0], sizes = [8, 96], strides = [1, 1]} : vector<8x128xf32> to vector<8x96xf32>
    %327 = arith.negf %326 : vector<8x96xf32>
    %328 = math.exp %327 : vector<8x96xf32>
    %cst_32 = arith.constant 1.000000e+00 : f32
    %329 = vector.broadcast %cst_32 : f32 to vector<8x96xf32>
    %330 = arith.addf %329, %328 : vector<8x96xf32>
    %331 = arith.divf %329, %330 : vector<8x96xf32>
    %332 = vector.extract_strided_slice %325 {offsets = [0, 96], sizes = [8, 32], strides = [1, 1]} : vector<8x128xf32> to vector<8x32xf32>
    %333 = math.tanh %332 : vector<8x32xf32>
    %334 = vector.extract_strided_slice %331 {offsets = [0, 0], sizes = [8, 32], strides = [1, 1]} : vector<8x96xf32> to vector<8x32xf32>
    %335 = vector.extract_strided_slice %331 {offsets = [0, 32], sizes = [8, 32], strides = [1, 1]} : vector<8x96xf32> to vector<8x32xf32>
    %336 = vector.extract_strided_slice %331 {offsets = [0, 64], sizes = [8, 32], strides = [1, 1]} : vector<8x96xf32> to vector<8x32xf32>
    %337 = arith.mulf %335, %298 : vector<8x32xf32>
    %338 = arith.mulf %334, %333 : vector<8x32xf32>
    %339 = arith.addf %337, %338 : vector<8x32xf32>
    %340 = math.tanh %339 : vector<8x32xf32>
    %341 = arith.mulf %336, %340 : vector<8x32xf32>
    %c0_33 = arith.constant 0 : index
    %c0_34 = arith.constant 0 : index
    %342 = vector.load %arg6[%c0_33, %c0_34] : memref<32x128xf32, #tpu.memory_space<vmem>>, vector<32x128xf32>
    %cst_35 = arith.constant dense<0.000000e+00> : vector<8x128xf32>
    %343 = tpu.matmul %341, %342, %cst_35 {dimension_numbers = #tpu.dot_dimension_numbers<[1], [0], [0], [1], [0, 0, 1, 1], [], []>} : vector<8x32xf32>, vector<32x128xf32>, vector<8x128xf32> -> vector<8x128xf32>
    %c0_36 = arith.constant 0 : index
    %c0_37 = arith.constant 0 : index
    %344 = vector.load %arg7[%c0_36, %c0_37] : memref<1x128xf32, #tpu.memory_space<vmem>>, vector<1x128xf32>
    %345 = vector.broadcast %344 : vector<1x128xf32> to vector<8x128xf32>
    %346 = arith.addf %343, %345 : vector<8x128xf32>
    %c0_38 = arith.constant 0 : index
    %c0_39 = arith.constant 0 : index
    %347 = vector.load %arg8[%c0_38, %c0_39] : memref<8x128xf32, #tpu.memory_space<vmem>>, vector<8x128xf32>
    tpu.vector_store %arg8[%c0_38, %c0_39], %346 {strides = array<i32>} : memref<8x128xf32, #tpu.memory_space<vmem>>, vector<8x128xf32>,
    return
  }
  func.func @transform_0(%arg0: i32) -> (i32, i32) {
    %c0_i32 = arith.constant 0 : i32
    %c0_i32_0 = arith.constant 0 : i32
    return %c0_i32, %arg0 : i32, i32
  }
  func.func @transform_1(%arg0: i32) -> (i32, i32) {
    %c0_i32 = arith.constant 0 : i32
    %c0_i32_0 = arith.constant 0 : i32
    %c0_i32_1 = arith.constant 0 : i32
    return %c0_i32, %c0_i32_0 : i32, i32
  }
  func.func @transform_2(%arg0: i32) -> (i32, i32) {
    %c0_i32 = arith.constant 0 : i32
    %c0_i32_0 = arith.constant 0 : i32
    %c0_i32_1 = arith.constant 0 : i32
    return %c0_i32, %c0_i32_0 : i32, i32
  }
  func.func @transform_3(%arg0: i32) -> (i32, i32) {
    %c0_i32 = arith.constant 0 : i32
    %c0_i32_0 = arith.constant 0 : i32
    %c0_i32_1 = arith.constant 0 : i32
    return %c0_i32, %c0_i32_0 : i32, i32
  }
  func.func @transform_4(%arg0: i32) -> (i32, i32) {
    %c0_i32 = arith.constant 0 : i32
    %c0_i32_0 = arith.constant 0 : i32
    %c0_i32_1 = arith.constant 0 : i32
    return %c0_i32, %c0_i32_0 : i32, i32
  }
  func.func @transform_5(%arg0: i32) -> (i32, i32) {
    %c0_i32 = arith.constant 0 : i32
    %c0_i32_0 = arith.constant 0 : i32
    %c0_i32_1 = arith.constant 0 : i32
    return %c0_i32, %c0_i32_0 : i32, i32
  }
  func.func @transform_6(%arg0: i32) -> (i32, i32) {
    %c0_i32 = arith.constant 0 : i32
    %c0_i32_0 = arith.constant 0 : i32
    %c0_i32_1 = arith.constant 0 : i32
    return %c0_i32, %c0_i32_0 : i32, i32
  }
  func.func @transform_7(%arg0: i32) -> (i32, i32) {
    %c0_i32 = arith.constant 0 : i32
    %c0_i32_0 = arith.constant 0 : i32
    return %arg0, %c0_i32 : i32, i32
  }
}

</mosaic_0001>

<bundles_post_ra>
// kernel: tpu_custom_call.1
= control target key start
LH: loop header
LB: loop body
LE: loop exit
PB: predicated region body
PF: predicated region fallthrough
CT: control target
= control target key end

     0   :  { %12 = vsyncpa [#allocation3], 0  ;;  %s1828_s0 = inlined_call_operand.hbm [shape: f32[8,8], index: 0, kind: input, shape index: {}]   ;;  %s1829_s1 = inlined_call_operand.vmem [shape: f32[1,128], index: 1, kind: input, shape index: {}]   ;;  %s1830_s2 = inlined_call_operand.vmem [shape: f32[1,128], index: 2, kind: input, shape index: {}]   ;;  %s1831_s3 = inlined_call_operand.hbm [shape: bf16[64,256], index: 3, kind: input, shape index: {}]   ;;  %s1832_s4 = inlined_call_operand.vmem [shape: f32[1,128], index: 4, kind: input, shape index: {}]   ;;  %s1833_s5 = inlined_call_operand.hbm [shape: f32[32,128], index: 5, kind: input, shape index: {}]   ;;  %s1834_s6 = inlined_call_operand.vmem [shape: f32[1,128], index: 6, kind: input, shape index: {}]   ;;  %s1835_s7 = inlined_call_operand.hbm [shape: f32[8,128], index: 7, kind: output, shape index: {}]  }
   0x1   :  { %13 = vsyncpa [#allocation6], 0 }
   0x2   :  { %14 = vsyncpa [#allocation4], 0  ;;  %s1446_s24 = smov [#allocation5]   ;;  %s1352_s28 = scalar_lea.hbm %s1831_s3, 1024 }
   0x3   :  { %s34_s25 = sshll.u32 %s1446_s24, 4  ;;  %p1353_p0 = scmp.ne.s32.totalorder %s1831_s3, %s1352_s28  ;;  %s35_s25 = int_to_ptr.vmem [resolvable:$true] %s34_s25 }
   0x4   :  { %p1356_p1 = scmp.lt.u32.totalorder %s1352_s28, %s1831_s3 }
   0x6   :  { %p1358_p2 = pnand %p1356_p1, %p1353_p0 }
   0x8   :  { %1361 = shalt.err (!%p1358_p2)
}
   0x9   :  { %s1362_s10 = scalar_lea.vmem %s35_s25, 1024  ;;  %p1367_p4 = scmp.lt.s32.totalorder %s35_s25, %s35_s25 }
   0xa   :  { %p1363_p3 = scmp.ne.s32.totalorder %s35_s25, %s1362_s10  ;;  %p1368_p5 = scmp.lt.s32.totalorder %s1362_s10, %s1362_s10 }
   0xc   :  { %p1369_p6 = por %p1368_p5, %p1367_p4 }
   0xe   :  { %p1370_p7 = pnand %p1369_p6, %p1363_p3 }
  0x10   :  { %1373 = shalt.err (!%p1370_p7)
}
  0x11   :  { %s1447_s11 = smov 128   ;;  %s1448_s12 = smov 8  }
  0x12   :  { %40 = dma.hbm_to_vmem [thread:$0]  %s1831_s3, 1024, %s35_s25, [#allocation6], %s1447_s11, %s1447_s11, %s1448_s12  }
  0x13   :  { %s1449_s15 = smov [#allocation2]   ;;  %s1450_s17 = smov [#allocation7]  }
  0x14   :  { %s21_s16 = sshll.u32 %s1449_s15, 4  ;;  %s48_s18 = sshll.u32 %s1450_s17, 4  ;;  %s22_s16 = int_to_ptr.vmem [resolvable:$true] %s21_s16  ;;  %s49_s18 = int_to_ptr.vmem [resolvable:$true] %s48_s18 }
  0x15   :  { %s1374_s21 = scalar_lea.hbm %s1828_s0, 128 }
  0x16   :  { %p1375_p8 = scmp.ne.s32.totalorder %s1828_s0, %s1374_s21  ;;  %p1378_p9 = scmp.lt.u32.totalorder %s1374_s21, %s1828_s0 }
  0x18   :  { %p1380_p10 = pnand %p1378_p9, %p1375_p8 }
  0x1a   :  { %1383 = shalt.err (!%p1380_p10)
}
  0x1b   :  { %s1384_s3 = scalar_lea.vmem %s22_s16, 128  ;;  %p1389_p12 = scmp.lt.s32.totalorder %s22_s16, %s22_s16 }
  0x1c   :  { %p1385_p11 = scmp.ne.s32.totalorder %s22_s16, %s1384_s3  ;;  %p1390_p13 = scmp.lt.s32.totalorder %s1384_s3, %s1384_s3 }
  0x1e   :  { %p1391_p0 = por %p1390_p13, %p1389_p12 }
  0x20   :  { %p1392_p1 = pnand %p1391_p0, %p1385_p11 }
  0x22   :  { %1395 = shalt.err (!%p1392_p1)
}
  0x23   :  { %24 = dma.hbm_to_vmem [thread:$0]  %s1828_s0, 128, %s22_s16, [#allocation3]  }
  0x24   :  { %s1396_s30 = scalar_lea.hbm %s1833_s5, 512 }
  0x25   :  { %p1397_p2 = scmp.ne.s32.totalorder %s1833_s5, %s1396_s30  ;;  %p1400_p3 = scmp.lt.u32.totalorder %s1396_s30, %s1833_s5 }
  0x27   :  { %p1402_p4 = pnand %p1400_p3, %p1397_p2 }
  0x29   :  { %1405 = shalt.err (!%p1402_p4)
}
  0x2a   :  { %s1406_s14 = scalar_lea.vmem %s49_s18, 512  ;;  %p1411_p6 = scmp.lt.s32.totalorder %s49_s18, %s49_s18 }
  0x2b   :  { %p1407_p5 = scmp.ne.s32.totalorder %s49_s18, %s1406_s14  ;;  %p1412_p7 = scmp.lt.s32.totalorder %s1406_s14, %s1406_s14 }
  0x2d   :  { %p1413_p8 = por %p1412_p7, %p1411_p6 }
  0x2f   :  { %p1414_p9 = pnand %p1413_p8, %p1407_p5 }
  0x31   :  { %1417 = shalt.err (!%p1414_p9)
}
  0x32   :  { %54 = dma.hbm_to_vmem [thread:$0]  %s1833_s5, 512, %s49_s18, [#allocation6], %s1447_s11, %s1447_s11, %s1448_s12  }
  0x33   :  { %1440 = dma.done.wait [#allocation3], 128  }
  0x34   :  { %1441 = vsyncadd [#allocation3], 4294967168 }
  0x35   :  { %1442 = dma.done.wait [#allocation6], 1536  }
  0x36   :  { %1443 = vsyncadd [#allocation6], 4294965760  ;;  %v78_v0 = vlaneseq  ;;  %v1544_v3 = vld [vmem:[#allocation2] sm:$0xff]  ;;  %s1451_s12 = smov 32   ;;  %v1564_v20 = vld [vmem:[#allocation5 + $0x4] ss:$8 sps:$4 sm:$0xff]  }
  0x37   :  { %v1550_v5 = vld [vmem:[%s1829_s1] ss:$0 sm:$0xff]  ;;  %v1566_v21 = vld [vmem:[#allocation5] ss:$8 sps:$4 sm:$0xff]   ;;  %v1568_v22 = vld [vmem:[#allocation5 + $0x14] ss:$8 sps:$4 sm:$0xff]   ;;  %244 = vmatprep.subr.bf16.mxu0 %v1564_v20  ;;  %348 = vmatprep.subr.bf16.mxu1 %v1564_v20 }
  0x38   :  { %v1541_v1 = vshrl.u32 %v78_v0, 7  ;;  %v1555_v6 = vld [vmem:[%s1830_s2] ss:$0 sm:$0xff]  ;;  %245 = vmatpush1.bf16.msra.mxu0 %v1566_v21  ;;  %349 = vmatpush1.bf16.msra.mxu1 %v1566_v21  ;;  %v1577_v24 = vld [vmem:[#allocation5 + $0x24] ss:$8 sps:$4 sm:$0xff]   ;;  %v1452_v29 = vmov 0  }
  0x39   :  { %v1573_v23 = vld [vmem:[#allocation5 + $0x10] ss:$8 sps:$4 sm:$0xff]   ;;  %246 = vmatprep.subr.bf16.mxu0 %v1568_v22  ;;  %350 = vmatprep.subr.bf16.mxu1 %v1568_v22  ;;  %v1581_v25 = vld [vmem:[#allocation5 + $0x20] ss:$8 sps:$4 sm:$0xff]   ;;  %v1585_v26 = vld [vmem:[#allocation5 + $0x34] ss:$8 sps:$4 sm:$0xff]  }
  0x3a   :  { %v80_v2 = vsub.s32 0, %v1541_v1  ;;  %v1593_v28 = vld [vmem:[#allocation5 + $0x30] ss:$8 sps:$4 sm:$0xff]   ;;  %276 = vmatprep.mubr.bf16.mxu0 %v1452_v29  ;;  %380 = vmatprep.mubr.bf16.mxu1 %v1452_v29  ;;  %v87_v30 = vsub.s32 1, %v1541_v1  ;;  %s1453_s1 = smov 64   ;;  %vm197_vm0 = vcmask 261120  }
  0x3b   :  { %vm240_vm1 = vcmask 523264   ;;  %v1619_v39 = vld [vmem:[%s1832_s4] ss:$0 sm:$0xff]  ;;  %s1454_s4 = smov 96   ;;  %vm1456_vm2 = vmmov 0   ;;  %s1458_s21 = smov [#allocation8]  }
  0x3c   :  { %v81_v4 = vrot.slane %v1544_v3, %v80_v2  ;;  %247 = vmatpush1.bf16.msra.mxu0 %v1573_v23  ;;  %351 = vmatpush1.bf16.msra.mxu1 %v1573_v23  ;;  %v88_v31 = vrot.slane %v1544_v3, %v87_v30  ;;  %s1130_s22 = sshll.u32 %s1458_s21, 4  ;;  %s1131_s22 = int_to_ptr.vmem [resolvable:$true] %s1130_s22 }
  0x3d   :  { %248 = vmatprep.subr.bf16.mxu0 %v1577_v24  ;;  %352 = vmatprep.subr.bf16.mxu1 %v1577_v24  ;;  %s1418_s23 = scalar_lea.vmem %s1131_s22, 128  ;;  %p1423_p11 = scmp.lt.s32.totalorder %s1131_s22, %s1131_s22 }
  0x3e   :  { %83 = vbcast.lane.b32.xlu0 %v81_v4, 256  ;;  %p1419_p10 = scmp.ne.s32.totalorder %s1131_s22, %s1418_s23  ;;  %p1424_p12 = scmp.lt.s32.totalorder %s1418_s23, %s1418_s23 }
  0x40   :  { %249 = vmatpush1.bf16.msra.mxu0 %v1581_v25  ;;  %353 = vmatpush1.bf16.msra.mxu1 %v1581_v25  ;;  %p1425_p13 = por %p1424_p12, %p1423_p11 }
  0x41   :  { %250 = vmatprep.subr.bf16.mxu0 %v1585_v26  ;;  %354 = vmatprep.subr.bf16.mxu1 %v1585_v26 }
  0x42   :  { %p1426_p0 = pnand %p1425_p13, %p1419_p10 }
  0x44   :  { %251 = vmatpush1.bf16.msra.mxu0 %v1593_v28  ;;  %355 = vmatpush1.bf16.msra.mxu1 %v1593_v28 }
  0x45   :  { %452 = vmatprep.subr.bf16.mxu0 %v1564_v20  ;;  %556 = vmatprep.subr.bf16.mxu1 %v1564_v20 }
  0xb0   :  { %v84_v7 = vpop.permute.xlu0 %83 }
  0xb1   :  { %v140_v8 = vmul.f32 %v1550_v5, %v84_v7 }
  0xb3   :  { %v154_v9 = vadd.f32 %v1555_v6, %v140_v8 }
  0xb5   :  { %1224 = vtanh.f32 %v154_v9  ;;  %v1143_v11 = vmul.f32 -1.442695, %v154_v9 }
  0xb7   :  { %1226 = vpow2.f32 %v1143_v11 }
  0xbf   :  { %v1225_v10 = vpop.eup %1224 }
  0xc0   :  { %178 = vrot.lane.b32.xlu0 %v1225_v10, %s1451_s12  ;;  %v94_v10 = vsub.s32 2, %v1541_v1 }
  0xc1   :  { %v1227_v12 = vpop.eup %1226 }
  0xc2   :  { %v172_v13 = vadd.f32 1.0, %v1227_v12 }
  0xc4   :  { %1228 = vrcp.f32 %v172_v13 }
  0xce   :  { %v1229_v14 = vpop.eup %1228 }
  0xcf   :  { %v176_v17 = vmul.f32 0.0, %v1229_v14 }
 0x132   :  { %v179_v15 = vpop.permute.xlu0 %178 }
 0x133   :  { %v181_v16 = vmul.f32 %v1229_v14, %v179_v15 }
 0x135   :  { %183 = vrot.lane.b32.xlu1 %v181_v16, %s1451_s12 }
 0x1a7   :  { %v184_v18 = vpop.permute.xlu1 %183 }
 0x1a8   :  { %v1561_v19 = vadd.f32 %v184_v18, %v176_v17 }
 0x1aa   :  { %1230 = vtanh.f32 %v1561_v19 }
 0x1b4   :  { %v1231_v27 = vpop.eup %1230 }
 0x1b5   :  { %189 = vrot.lane.b32.xlu1 %v1231_v27, %s1451_s12 }
 0x1b9   :  { %90 = vbcast.lane.b32.xlu1 %v88_v31, 256 }
 0x227   :  { %v190_v32 = vpop.permute.xlu1 %189 }
 0x228   :  { %v192_v33 = vmul.f32 %v1229_v14, %v190_v32  ;;  %v95_v14 = vrot.slane %v1544_v3, %v94_v10 }
 0x22a   :  { %194 = vrot.lane.b32.xlu0 %v192_v33, %s1453_s1 }
 0x22b   :  { %v91_v37 = vpop.permute.xlu1 %90 }
 0x22c   :  { %v141_v38 = vmul.f32 %v1550_v5, %v91_v37 }
 0x22e   :  { %v155_v40 = vadd.f32 %v1555_v6, %v141_v38 }
 0x29c   :  { %v195_v34 = vpop.permute.xlu0 %194 }
 0x29d   :  { %v198_v35 = vsel %vm197_vm0, %v195_v34, 0.0 }
 0x29e   :  { %v199_v36 = vpack.c.bf16 %v198_v35, %v198_v35 }
 0x2a0   :  { %1152 = vmatmul.mubr.msk.bf16.vlgmr.msra.gmra.mrb[0].mxu0 %vm240_vm1, %v199_v36 }
 0x2a1   :  { %453 = vmatpush1.bf16.msra.mxu0 %v1566_v21  ;;  %484 = vmatprep.mubr.bf16.mxu0 %v1452_v29 }
 0x2a2   :  { %454 = vmatprep.subr.bf16.mxu0 %v1568_v22 }
 0x2a5   :  { %455 = vmatpush1.bf16.msra.mxu0 %v1573_v23 }
 0x2a6   :  { %456 = vmatprep.subr.bf16.mxu0 %v1577_v24 }
 0x2a9   :  { %457 = vmatpush1.bf16.msra.mxu0 %v1581_v25 }
 0x2aa   :  { %458 = vmatprep.subr.bf16.mxu0 %v1585_v26 }
 0x2ad   :  { %459 = vmatpush1.bf16.msra.mxu0 %v1593_v28 }
 0x2ae   :  { %660 = vmatprep.subr.bf16.mxu0 %v1564_v20 }
 0x373   :  { %v278_v41 = vpop.f32.mrb[0].mxu0 }
 0x374   :  { %v285_v42 = vadd.f32 %v1619_v39, %v278_v41  ;;  %v280_v43 = vpop.f32.mrb[1].mxu0 }
 0x375   :  { %v310_v44 = vadd.f32 %v280_v43, %v155_v40  ;;  %v282_v45 = vpop.f32.mrb[2].mxu0 }
 0x376   :  { %1232 = vtanh.f32 %v285_v42  ;;  %v283_v46 = vpop.f32.mrb[3].mxu0  ;;  %v1153_v49 = vmul.f32 -1.442695, %v285_v42 }
 0x377   :  { %1234 = vtanh.f32 %v310_v44  ;;  %v1154_v50 = vmul.f32 -1.442695, %v310_v44 }
 0x378   :  { %1236 = vpow2.f32 %v1153_v49 }
 0x379   :  { %1238 = vpow2.f32 %v1154_v50 }
 0x380   :  { %v1233_v47 = vpop.eup %1232 }
 0x381   :  { %v1235_v48 = vpop.eup %1234  ;;  %295 = vrot.lane.b32.xlu0 %v1233_v47, %s1451_s12 }
 0x382   :  { %320 = vrot.lane.b32.xlu1 %v1235_v48, %s1451_s12  ;;  %v1237_v51 = vpop.eup %1236 }
 0x383   :  { %v1239_v52 = vpop.eup %1238  ;;  %v289_v53 = vadd.f32 1.0, %v1237_v51 }
 0x384   :  { %v314_v54 = vadd.f32 1.0, %v1239_v52 }
 0x385   :  { %1240 = vrcp.f32 %v289_v53 }
 0x386   :  { %1242 = vrcp.f32 %v314_v54 }
 0x38f   :  { %v1241_v55 = vpop.eup %1240 }
 0x390   :  { %v1243_v57 = vpop.eup %1242  ;;  %v293_v61 = vmul.f32 0.0, %v1241_v55 }
 0x391   :  { %v318_v63 = vmul.f32 %v1243_v57, %v1561_v19 }
 0x3f3   :  { %v296_v56 = vpop.permute.xlu0 %295 }
 0x3f4   :  { %v298_v58 = vmul.f32 %v1241_v55, %v296_v56  ;;  %v321_v59 = vpop.permute.xlu1 %320 }
 0x3f5   :  { %v323_v60 = vmul.f32 %v1243_v57, %v321_v59 }
 0x3f6   :  { %300 = vrot.lane.b32.xlu0 %v298_v58, %s1451_s12 }
 0x3f7   :  { %325 = vrot.lane.b32.xlu1 %v323_v60, %s1451_s12 }
 0x468   :  { %v301_v62 = vpop.permute.xlu0 %300 }
 0x469   :  { %v1628_v0 = vadd.f32 %v301_v62, %v293_v61  ;;  %v326_v2 = vpop.permute.xlu1 %325  ;;  %v101_v61 = vsub.s32 3, %v1541_v1 }
 0x46a   :  { %v1630_v4 = vadd.f32 %v326_v2, %v318_v63 }
 0x46b   :  { %1244 = vtanh.f32 %v1628_v0  ;;  %v102_v2 = vrot.slane %v1544_v3, %v101_v61 }
 0x46c   :  { %1246 = vtanh.f32 %v1630_v4 }
 0x475   :  { %v1245_v7 = vpop.eup %1244 }
 0x476   :  { %v1247_v8 = vpop.eup %1246  ;;  %306 = vrot.lane.b32.xlu0 %v1245_v7, %s1451_s12 }
 0x477   :  { %331 = vrot.lane.b32.xlu1 %v1247_v8, %s1451_s12 }
 0x4e8   :  { %v307_v9 = vpop.permute.xlu0 %306 }
 0x4e9   :  { %v309_v11 = vmul.f32 %v1241_v55, %v307_v9  ;;  %v332_v12 = vpop.permute.xlu1 %331 }
 0x4ea   :  { %v334_v13 = vmul.f32 %v1243_v57, %v332_v12 }
 0x4eb   :  { %340 = vrot.lane.b32.xlu1 %v309_v11, %s1454_s4 }
 0x4ec   :  { %336 = vrot.lane.b32.xlu0 %v334_v13, %s1453_s1 }
 0x4f0   :  { %97 = vbcast.lane.b32.xlu0 %v95_v14, 256 }
 0x55d   :  { %v341_v15 = vpop.permute.xlu1 %340 }
 0x55e   :  { %v337_v16 = vpop.permute.xlu0 %336 }
 0x55f   :  { %v343_v17 = vsel %vm197_vm0, %v337_v16, %v341_v15 }
 0x560   :  { %v344_v18 = vpack.c.bf16 %v343_v17, %v343_v17 }
 0x562   :  { %1155 = vmatmul.mubr.msk.bf16.vlgmr.msra.gmra.mrb[0].mxu1 %vm240_vm1, %v344_v18  ;;  %v98_v19 = vpop.permute.xlu0 %97 }
 0x563   :  { %557 = vmatpush1.bf16.msra.mxu1 %v1566_v21  ;;  %588 = vmatprep.mubr.bf16.mxu1 %v1452_v29  ;;  %v142_v27 = vmul.f32 %v1550_v5, %v98_v19 }
 0x564   :  { %558 = vmatprep.subr.bf16.mxu1 %v1568_v22 }
 0x565   :  { %v156_v30 = vadd.f32 %v1555_v6, %v142_v27 }
 0x567   :  { %559 = vmatpush1.bf16.msra.mxu1 %v1573_v23 }
 0x568   :  { %560 = vmatprep.subr.bf16.mxu1 %v1577_v24 }
 0x56b   :  { %561 = vmatpush1.bf16.msra.mxu1 %v1581_v25 }
 0x56c   :  { %562 = vmatprep.subr.bf16.mxu1 %v1585_v26 }
 0x56f   :  { %563 = vmatpush1.bf16.msra.mxu1 %v1593_v28 }
 0x570   :  { %764 = vmatprep.subr.bf16.mxu1 %v1564_v20 }
 0x635   :  { %v382_v31 = vpop.f32.mrb[0].mxu1 }
 0x636   :  { %v389_v32 = vadd.f32 %v1619_v39, %v382_v31  ;;  %v384_v33 = vpop.f32.mrb[1].mxu1 }
 0x637   :  { %v414_v34 = vadd.f32 %v384_v33, %v156_v30  ;;  %v386_v35 = vpop.f32.mrb[2].mxu1 }
 0x638   :  { %1248 = vtanh.f32 %v389_v32  ;;  %v387_v36 = vpop.f32.mrb[3].mxu1  ;;  %v1156_v40 = vmul.f32 -1.442695, %v389_v32 }
 0x639   :  { %1250 = vtanh.f32 %v414_v34  ;;  %v1157_v41 = vmul.f32 -1.442695, %v414_v34 }
 0x63a   :  { %1252 = vpow2.f32 %v1156_v40 }
 0x63b   :  { %1254 = vpow2.f32 %v1157_v41 }
 0x642   :  { %v1249_v37 = vpop.eup %1248 }
 0x643   :  { %v1251_v38 = vpop.eup %1250  ;;  %399 = vrot.lane.b32.xlu1 %v1249_v37, %s1451_s12 }
 0x644   :  { %424 = vrot.lane.b32.xlu0 %v1251_v38, %s1451_s12  ;;  %v1253_v42 = vpop.eup %1252 }
 0x645   :  { %v1255_v43 = vpop.eup %1254  ;;  %v393_v44 = vadd.f32 1.0, %v1253_v42 }
 0x646   :  { %v418_v45 = vadd.f32 1.0, %v1255_v43 }
 0x647   :  { %1256 = vrcp.f32 %v393_v44 }
 0x648   :  { %1258 = vrcp.f32 %v418_v45 }
 0x651   :  { %v1257_v46 = vpop.eup %1256 }
 0x652   :  { %v1259_v48 = vpop.eup %1258  ;;  %v397_v52 = vmul.f32 %v1257_v46, %v1628_v0 }
 0x653   :  { %v422_v54 = vmul.f32 %v1259_v48, %v1630_v4 }
 0x6b5   :  { %v400_v47 = vpop.permute.xlu1 %399 }
 0x6b6   :  { %v402_v49 = vmul.f32 %v1257_v46, %v400_v47  ;;  %v425_v50 = vpop.permute.xlu0 %424 }
 0x6b7   :  { %v427_v51 = vmul.f32 %v1259_v48, %v425_v50 }
 0x6b8   :  { %404 = vrot.lane.b32.xlu1 %v402_v49, %s1451_s12 }
 0x6b9   :  { %429 = vrot.lane.b32.xlu0 %v427_v51, %s1451_s12 }
 0x72a   :  { %v405_v53 = vpop.permute.xlu1 %404 }
 0x72b   :  { %v1660_v55 = vadd.f32 %v405_v53, %v397_v52  ;;  %v430_v56 = vpop.permute.xlu0 %429  ;;  %v108_v52 = vsub.s32 4, %v1541_v1 }
 0x72c   :  { %v1662_v57 = vadd.f32 %v430_v56, %v422_v54 }
 0x72d   :  { %1260 = vtanh.f32 %v1660_v55  ;;  %v109_v56 = vrot.slane %v1544_v3, %v108_v52 }
 0x72e   :  { %1262 = vtanh.f32 %v1662_v57 }
 0x737   :  { %v1261_v58 = vpop.eup %1260 }
 0x738   :  { %v1263_v59 = vpop.eup %1262  ;;  %410 = vrot.lane.b32.xlu1 %v1261_v58, %s1451_s12 }
 0x739   :  { %435 = vrot.lane.b32.xlu0 %v1263_v59, %s1451_s12 }
 0x7aa   :  { %v411_v60 = vpop.permute.xlu1 %410 }
 0x7ab   :  { %v413_v62 = vmul.f32 %v1257_v46, %v411_v60  ;;  %v436_v63 = vpop.permute.xlu0 %435 }
 0x7ac   :  { %v438_v0 = vmul.f32 %v1259_v48, %v436_v63 }
 0x7ad   :  { %444 = vrot.lane.b32.xlu0 %v413_v62, %s1454_s4 }
 0x7ae   :  { %440 = vrot.lane.b32.xlu1 %v438_v0, %s1453_s1 }
 0x7b2   :  { %104 = vbcast.lane.b32.xlu1 %v102_v2, 256 }
 0x81f   :  { %v445_v4 = vpop.permute.xlu0 %444 }
 0x820   :  { %v441_v7 = vpop.permute.xlu1 %440 }
 0x821   :  { %v447_v8 = vsel %vm197_vm0, %v441_v7, %v445_v4 }
 0x822   :  { %v448_v9 = vpack.c.bf16 %v447_v8, %v447_v8 }
 0x824   :  { %1158 = vmatmul.mubr.msk.bf16.vlgmr.msra.gmra.mrb[4].mxu0 %vm240_vm1, %v448_v9  ;;  %v105_v10 = vpop.permute.xlu1 %104 }
 0x825   :  { %661 = vmatpush1.bf16.msra.mxu0 %v1566_v21  ;;  %692 = vmatprep.mubr.bf16.mxu0 %v1452_v29  ;;  %v143_v11 = vmul.f32 %v1550_v5, %v105_v10 }
 0x826   :  { %662 = vmatprep.subr.bf16.mxu0 %v1568_v22 }
 0x827   :  { %v157_v12 = vadd.f32 %v1555_v6, %v143_v11 }
 0x829   :  { %663 = vmatpush1.bf16.msra.mxu0 %v1573_v23 }
 0x82a   :  { %664 = vmatprep.subr.bf16.mxu0 %v1577_v24 }
 0x82d   :  { %665 = vmatpush1.bf16.msra.mxu0 %v1581_v25 }
 0x82e   :  { %666 = vmatprep.subr.bf16.mxu0 %v1585_v26 }
 0x831   :  { %667 = vmatpush1.bf16.msra.mxu0 %v1593_v28 }
 0x832   :  { %868 = vmatprep.subr.bf16.mxu0 %v1564_v20 }
 0x8f7   :  { %v486_v13 = vpop.f32.mrb[4].mxu0 }
 0x8f8   :  { %v493_v14 = vadd.f32 %v1619_v39, %v486_v13  ;;  %v488_v15 = vpop.f32.mrb[5].mxu0 }
 0x8f9   :  { %v518_v16 = vadd.f32 %v488_v15, %v157_v12  ;;  %v490_v17 = vpop.f32.mrb[6].mxu0 }
 0x8fa   :  { %1264 = vtanh.f32 %v493_v14  ;;  %v491_v18 = vpop.f32.mrb[7].mxu0  ;;  %v1159_v30 = vmul.f32 -1.442695, %v493_v14 }
 0x8fb   :  { %1266 = vtanh.f32 %v518_v16  ;;  %v1160_v31 = vmul.f32 -1.442695, %v518_v16 }
 0x8fc   :  { %1268 = vpow2.f32 %v1159_v30 }
 0x8fd   :  { %1270 = vpow2.f32 %v1160_v31 }
 0x904   :  { %v1265_v19 = vpop.eup %1264 }
 0x905   :  { %v1267_v27 = vpop.eup %1266  ;;  %503 = vrot.lane.b32.xlu0 %v1265_v19, %s1451_s12 }
 0x906   :  { %528 = vrot.lane.b32.xlu1 %v1267_v27, %s1451_s12  ;;  %v1269_v32 = vpop.eup %1268 }
 0x907   :  { %v1271_v33 = vpop.eup %1270  ;;  %v497_v34 = vadd.f32 1.0, %v1269_v32 }
 0x908   :  { %v522_v35 = vadd.f32 1.0, %v1271_v33 }
 0x909   :  { %1272 = vrcp.f32 %v497_v34 }
 0x90a   :  { %1274 = vrcp.f32 %v522_v35 }
 0x913   :  { %v1273_v36 = vpop.eup %1272 }
 0x914   :  { %v1275_v38 = vpop.eup %1274  ;;  %v501_v43 = vmul.f32 %v1273_v36, %v1660_v55 }
 0x915   :  { %v526_v45 = vmul.f32 %v1275_v38, %v1662_v57 }
 0x977   :  { %v504_v37 = vpop.permute.xlu0 %503 }
 0x978   :  { %v506_v40 = vmul.f32 %v1273_v36, %v504_v37  ;;  %v529_v41 = vpop.permute.xlu1 %528 }
 0x979   :  { %v531_v42 = vmul.f32 %v1275_v38, %v529_v41 }
 0x97a   :  { %508 = vrot.lane.b32.xlu0 %v506_v40, %s1451_s12 }
 0x97b   :  { %533 = vrot.lane.b32.xlu1 %v531_v42, %s1451_s12  ;;  %v115_v42 = vsub.s32 5, %v1541_v1 }
 0x9ec   :  { %v509_v44 = vpop.permute.xlu0 %508 }
 0x9ed   :  { %v1692_v46 = vadd.f32 %v509_v44, %v501_v43  ;;  %v534_v47 = vpop.permute.xlu1 %533 }
 0x9ee   :  { %v1694_v48 = vadd.f32 %v534_v47, %v526_v45 }
 0x9ef   :  { %1276 = vtanh.f32 %v1692_v46 }
 0x9f0   :  { %1278 = vtanh.f32 %v1694_v48 }
 0x9f9   :  { %v1277_v49 = vpop.eup %1276 }
 0x9fa   :  { %v1279_v50 = vpop.eup %1278  ;;  %514 = vrot.lane.b32.xlu0 %v1277_v49, %s1451_s12 }
 0x9fb   :  { %539 = vrot.lane.b32.xlu1 %v1279_v50, %s1451_s12 }
 0xa6c   :  { %v515_v51 = vpop.permute.xlu0 %514 }
 0xa6d   :  { %v517_v53 = vmul.f32 %v1273_v36, %v515_v51  ;;  %v540_v54 = vpop.permute.xlu1 %539 }
 0xa6e   :  { %v542_v55 = vmul.f32 %v1275_v38, %v540_v54 }
 0xa6f   :  { %548 = vrot.lane.b32.xlu1 %v517_v53, %s1454_s4 }
 0xa70   :  { %544 = vrot.lane.b32.xlu0 %v542_v55, %s1453_s1 }
 0xa74   :  { %111 = vbcast.lane.b32.xlu0 %v109_v56, 256 }
 0xae1   :  { %v549_v57 = vpop.permute.xlu1 %548 }
 0xae2   :  { %v545_v58 = vpop.permute.xlu0 %544 }
 0xae3   :  { %v551_v59 = vsel %vm197_vm0, %v545_v58, %v549_v57 }
 0xae4   :  { %v552_v60 = vpack.c.bf16 %v551_v59, %v551_v59 }
 0xae6   :  { %1161 = vmatmul.mubr.msk.bf16.vlgmr.msra.gmra.mrb[4].mxu1 %vm240_vm1, %v552_v60  ;;  %v112_v61 = vpop.permute.xlu0 %111 }
 0xae7   :  { %765 = vmatpush1.bf16.msra.mxu1 %v1566_v21  ;;  %796 = vmatprep.mubr.bf16.mxu1 %v1452_v29  ;;  %v144_v62 = vmul.f32 %v1550_v5, %v112_v61 }
 0xae8   :  { %766 = vmatprep.subr.bf16.mxu1 %v1568_v22 }
 0xae9   :  { %v158_v63 = vadd.f32 %v1555_v6, %v144_v62 }
 0xaeb   :  { %767 = vmatpush1.bf16.msra.mxu1 %v1573_v23 }
 0xaec   :  { %768 = vmatprep.subr.bf16.mxu1 %v1577_v24 }
 0xaef   :  { %769 = vmatpush1.bf16.msra.mxu1 %v1581_v25 }
 0xaf0   :  { %770 = vmatprep.subr.bf16.mxu1 %v1585_v26 }
 0xaf3   :  { %771 = vmatpush1.bf16.msra.mxu1 %v1593_v28 }
 0xaf4   :  { %972 = vmatprep.subr.bf16.mxu1 %v1564_v20 }
 0xbb9   :  { %v590_v0 = vpop.f32.mrb[4].mxu1 }
 0xbba   :  { %v597_v2 = vadd.f32 %v1619_v39, %v590_v0  ;;  %v592_v4 = vpop.f32.mrb[5].mxu1 }
 0xbbb   :  { %v622_v7 = vadd.f32 %v592_v4, %v158_v63  ;;  %v594_v8 = vpop.f32.mrb[6].mxu1 }
 0xbbc   :  { %1280 = vtanh.f32 %v597_v2  ;;  %v595_v9 = vpop.f32.mrb[7].mxu1  ;;  %v1162_v20 = vmul.f32 -1.442695, %v597_v2 }
 0xbbd   :  { %1282 = vtanh.f32 %v622_v7  ;;  %v1163_v12 = vmul.f32 -1.442695, %v622_v7 }
 0xbbe   :  { %1284 = vpow2.f32 %v1162_v20 }
 0xbbf   :  { %1286 = vpow2.f32 %v1163_v12 }
 0xbc6   :  { %v1281_v10 = vpop.eup %1280 }
 0xbc7   :  { %v1283_v11 = vpop.eup %1282  ;;  %607 = vrot.lane.b32.xlu1 %v1281_v10, %s1451_s12 }
 0xbc8   :  { %632 = vrot.lane.b32.xlu0 %v1283_v11, %s1451_s12  ;;  %v1285_v13 = vpop.eup %1284 }
 0xbc9   :  { %v1287_v14 = vpop.eup %1286  ;;  %v601_v15 = vadd.f32 1.0, %v1285_v13 }
 0xbca   :  { %v626_v16 = vadd.f32 1.0, %v1287_v14 }
 0xbcb   :  { %1288 = vrcp.f32 %v601_v15 }
 0xbcc   :  { %1290 = vrcp.f32 %v626_v16 }
 0xbd5   :  { %v1289_v17 = vpop.eup %1288 }
 0xbd6   :  { %v1291_v19 = vpop.eup %1290  ;;  %v605_v32 = vmul.f32 %v1289_v17, %v1692_v46  ;;  %v116_v46 = vrot.slane %v1544_v3, %v115_v42 }
 0xbd7   :  { %v630_v34 = vmul.f32 %v1291_v19, %v1694_v48 }
 0xc39   :  { %v608_v18 = vpop.permute.xlu1 %607 }
 0xc3a   :  { %v610_v27 = vmul.f32 %v1289_v17, %v608_v18  ;;  %v633_v30 = vpop.permute.xlu0 %632 }
 0xc3b   :  { %v635_v31 = vmul.f32 %v1291_v19, %v633_v30 }
 0xc3c   :  { %612 = vrot.lane.b32.xlu1 %v610_v27, %s1451_s12 }
 0xc3d   :  { %637 = vrot.lane.b32.xlu0 %v635_v31, %s1451_s12  ;;  %v122_v31 = vsub.s32 6, %v1541_v1 }
 0xcae   :  { %v613_v33 = vpop.permute.xlu1 %612 }
 0xcaf   :  { %v1724_v35 = vadd.f32 %v613_v33, %v605_v32  ;;  %v638_v36 = vpop.permute.xlu0 %637 }
 0xcb0   :  { %v1726_v37 = vadd.f32 %v638_v36, %v630_v34 }
 0xcb1   :  { %1292 = vtanh.f32 %v1724_v35 }
 0xcb2   :  { %1294 = vtanh.f32 %v1726_v37 }
 0xcbb   :  { %v1293_v38 = vpop.eup %1292 }
 0xcbc   :  { %v1295_v40 = vpop.eup %1294  ;;  %618 = vrot.lane.b32.xlu1 %v1293_v38, %s1451_s12 }
 0xcbd   :  { %643 = vrot.lane.b32.xlu0 %v1295_v40, %s1451_s12 }
 0xd2e   :  { %v619_v41 = vpop.permute.xlu1 %618 }
 0xd2f   :  { %v621_v43 = vmul.f32 %v1289_v17, %v619_v41  ;;  %v644_v44 = vpop.permute.xlu0 %643 }
 0xd30   :  { %v646_v45 = vmul.f32 %v1291_v19, %v644_v44 }
 0xd31   :  { %652 = vrot.lane.b32.xlu0 %v621_v43, %s1454_s4 }
 0xd32   :  { %648 = vrot.lane.b32.xlu1 %v646_v45, %s1453_s1 }
 0xd36   :  { %118 = vbcast.lane.b32.xlu1 %v116_v46, 256 }
 0xda3   :  { %v653_v47 = vpop.permute.xlu0 %652 }
 0xda4   :  { %v649_v48 = vpop.permute.xlu1 %648 }
 0xda5   :  { %v655_v49 = vsel %vm197_vm0, %v649_v48, %v653_v47 }
 0xda6   :  { %v656_v50 = vpack.c.bf16 %v655_v49, %v655_v49 }
 0xda8   :  { %1164 = vmatmul.mubr.msk.bf16.vlgmr.msra.gmra.mrb[8].mxu0 %vm240_vm1, %v656_v50  ;;  %v119_v51 = vpop.permute.xlu1 %118 }
 0xda9   :  { %869 = vmatpush1.bf16.msra.mxu0 %v1566_v21  ;;  %900 = vmatprep.mubr.bf16.mxu0 %v1452_v29  ;;  %v145_v52 = vmul.f32 %v1550_v5, %v119_v51 }
 0xdaa   :  { %870 = vmatprep.subr.bf16.mxu0 %v1568_v22 }
 0xdab   :  { %v159_v53 = vadd.f32 %v1555_v6, %v145_v52 }
 0xdad   :  { %871 = vmatpush1.bf16.msra.mxu0 %v1573_v23 }
 0xdae   :  { %872 = vmatprep.subr.bf16.mxu0 %v1577_v24 }
 0xdb1   :  { %873 = vmatpush1.bf16.msra.mxu0 %v1581_v25 }
 0xdb2   :  { %874 = vmatprep.subr.bf16.mxu0 %v1585_v26 }
 0xdb5   :  { %875 = vmatpush1.bf16.msra.mxu0 %v1593_v28 }
 0xe7b   :  { %v694_v54 = vpop.f32.mrb[8].mxu0 }
 0xe7c   :  { %v701_v55 = vadd.f32 %v1619_v39, %v694_v54  ;;  %v696_v56 = vpop.f32.mrb[9].mxu0 }
 0xe7d   :  { %v726_v57 = vadd.f32 %v696_v56, %v159_v53  ;;  %v698_v58 = vpop.f32.mrb[10].mxu0 }
 0xe7e   :  { %1296 = vtanh.f32 %v701_v55  ;;  %v699_v59 = vpop.f32.mrb[11].mxu0  ;;  %v1165_v62 = vmul.f32 -1.442695, %v701_v55 }
 0xe7f   :  { %1298 = vtanh.f32 %v726_v57  ;;  %v1166_v63 = vmul.f32 -1.442695, %v726_v57 }
 0xe80   :  { %1300 = vpow2.f32 %v1165_v62 }
 0xe81   :  { %1302 = vpow2.f32 %v1166_v63 }
 0xe88   :  { %v1297_v60 = vpop.eup %1296 }
 0xe89   :  { %v1299_v61 = vpop.eup %1298  ;;  %711 = vrot.lane.b32.xlu0 %v1297_v60, %s1451_s12 }
 0xe8a   :  { %736 = vrot.lane.b32.xlu1 %v1299_v61, %s1451_s12  ;;  %v1301_v0 = vpop.eup %1300 }
 0xe8b   :  { %v1303_v2 = vpop.eup %1302  ;;  %v705_v4 = vadd.f32 1.0, %v1301_v0 }
 0xe8c   :  { %v730_v7 = vadd.f32 1.0, %v1303_v2  ;;  %v129_v2 = vsub.s32 7, %v1541_v1 }
 0xe8d   :  { %1304 = vrcp.f32 %v705_v4 }
 0xe8e   :  { %1306 = vrcp.f32 %v730_v7 }
 0xe97   :  { %v1305_v8 = vpop.eup %1304 }
 0xe98   :  { %v1307_v10 = vpop.eup %1306  ;;  %v709_v13 = vmul.f32 %v1305_v8, %v1724_v35  ;;  %v123_v35 = vrot.slane %v1544_v3, %v122_v31 }
 0xe99   :  { %v734_v15 = vmul.f32 %v1307_v10, %v1726_v37 }
 0xefb   :  { %v712_v9 = vpop.permute.xlu0 %711 }
 0xefc   :  { %v714_v11 = vmul.f32 %v1305_v8, %v712_v9  ;;  %v737_v20 = vpop.permute.xlu1 %736  ;;  %v130_v9 = vrot.slane %v1544_v3, %v129_v2  ;;  %v1038_v2 = vld [vmem:[#allocation7 + $0x8] sm:$0xff] }
 0xefd   :  { %v739_v12 = vmul.f32 %v1307_v10, %v737_v20 }
 0xefe   :  { %716 = vrot.lane.b32.xlu0 %v714_v11, %s1451_s12 }
 0xeff   :  { %741 = vrot.lane.b32.xlu1 %v739_v12, %s1451_s12 }
 0xf70   :  { %v717_v14 = vpop.permute.xlu0 %716 }
 0xf71   :  { %v1755_v16 = vadd.f32 %v717_v14, %v709_v13  ;;  %v742_v17 = vpop.permute.xlu1 %741 }
 0xf72   :  { %v1757_v18 = vadd.f32 %v742_v17, %v734_v15 }
 0xf73   :  { %1308 = vtanh.f32 %v1755_v16 }
 0xf74   :  { %1310 = vtanh.f32 %v1757_v18 }
 0xf7d   :  { %v1309_v19 = vpop.eup %1308 }
 0xf7e   :  { %v1311_v27 = vpop.eup %1310  ;;  %722 = vrot.lane.b32.xlu0 %v1309_v19, %s1451_s12 }
 0xf7f   :  { %747 = vrot.lane.b32.xlu1 %v1311_v27, %s1451_s12 }
 0xff0   :  { %v723_v30 = vpop.permute.xlu0 %722 }
 0xff1   :  { %v725_v32 = vmul.f32 %v1305_v8, %v723_v30  ;;  %v748_v33 = vpop.permute.xlu1 %747 }
 0xff2   :  { %v750_v34 = vmul.f32 %v1307_v10, %v748_v33 }
 0xff3   :  { %756 = vrot.lane.b32.xlu1 %v725_v32, %s1454_s4 }
 0xff4   :  { %752 = vrot.lane.b32.xlu0 %v750_v34, %s1453_s1 }
 0xff8   :  { %125 = vbcast.lane.b32.xlu0 %v123_v35, 256 }
0x1065   :  { %v757_v36 = vpop.permute.xlu1 %756 }
0x1066   :  { %v753_v37 = vpop.permute.xlu0 %752 }
0x1067   :  { %v759_v38 = vsel %vm197_vm0, %v753_v37, %v757_v36 }
0x1068   :  { %v760_v40 = vpack.c.bf16 %v759_v38, %v759_v38 }
0x106a   :  { %1167 = vmatmul.mubr.msk.bf16.vlgmr.msra.gmra.mrb[8].mxu1 %vm240_vm1, %v760_v40  ;;  %v126_v41 = vpop.permute.xlu0 %125 }
0x106b   :  { %973 = vmatpush1.bf16.msra.mxu1 %v1566_v21  ;;  %1004 = vmatprep.mubr.bf16.mxu1 %v1452_v29  ;;  %v146_v42 = vmul.f32 %v1550_v5, %v126_v41 }
0x106c   :  { %974 = vmatprep.subr.bf16.mxu1 %v1568_v22 }
0x106d   :  { %v160_v43 = vadd.f32 %v1555_v6, %v146_v42 }
0x106f   :  { %975 = vmatpush1.bf16.msra.mxu1 %v1573_v23 }
0x1070   :  { %976 = vmatprep.subr.bf16.mxu1 %v1577_v24 }
0x1073   :  { %977 = vmatpush1.bf16.msra.mxu1 %v1581_v25 }
0x1074   :  { %978 = vmatprep.subr.bf16.mxu1 %v1585_v26 }
0x1077   :  { %979 = vmatpush1.bf16.msra.mxu1 %v1593_v28 }
0x113d   :  { %v798_v21 = vpop.f32.mrb[8].mxu1 }
0x113e   :  { %v805_v29 = vadd.f32 %v1619_v39, %v798_v21  ;;  %v800_v44 = vpop.f32.mrb[9].mxu1 }
0x113f   :  { %v830_v22 = vadd.f32 %v800_v44, %v160_v43  ;;  %v802_v45 = vpop.f32.mrb[10].mxu1 }
0x1140   :  { %1312 = vtanh.f32 %v805_v29  ;;  %v803_v23 = vpop.f32.mrb[11].mxu1  ;;  %v1168_v26 = vmul.f32 -1.442695, %v805_v29 }
0x1141   :  { %1314 = vtanh.f32 %v830_v22  ;;  %v1169_v28 = vmul.f32 -1.442695, %v830_v22 }
0x1142   :  { %1316 = vpow2.f32 %v1168_v26 }
0x1143   :  { %1318 = vpow2.f32 %v1169_v28 }
0x114a   :  { %v1313_v24 = vpop.eup %1312 }
0x114b   :  { %v1315_v25 = vpop.eup %1314  ;;  %815 = vrot.lane.b32.xlu1 %v1313_v24, %s1451_s12 }
0x114c   :  { %840 = vrot.lane.b32.xlu0 %v1315_v25, %s1451_s12  ;;  %v1317_v46 = vpop.eup %1316 }
0x114d   :  { %v1319_v47 = vpop.eup %1318  ;;  %v809_v48 = vadd.f32 1.0, %v1317_v46 }
0x114e   :  { %v834_v49 = vadd.f32 1.0, %v1319_v47 }
0x114f   :  { %1320 = vrcp.f32 %v809_v48 }
0x1150   :  { %1322 = vrcp.f32 %v834_v49 }
0x1159   :  { %v1321_v50 = vpop.eup %1320 }
0x115a   :  { %v1323_v52 = vpop.eup %1322  ;;  %v813_v56 = vmul.f32 %v1321_v50, %v1755_v16 }
0x115b   :  { %v838_v58 = vmul.f32 %v1323_v52, %v1757_v18 }
0x11bd   :  { %v816_v51 = vpop.permute.xlu1 %815 }
0x11be   :  { %v818_v53 = vmul.f32 %v1321_v50, %v816_v51  ;;  %v841_v54 = vpop.permute.xlu0 %840 }
0x11bf   :  { %v843_v55 = vmul.f32 %v1323_v52, %v841_v54 }
0x11c0   :  { %820 = vrot.lane.b32.xlu1 %v818_v53, %s1451_s12 }
0x11c1   :  { %845 = vrot.lane.b32.xlu0 %v843_v55, %s1451_s12 }
0x1232   :  { %v821_v57 = vpop.permute.xlu1 %820 }
0x1233   :  { %v823_v59 = vadd.f32 %v821_v57, %v813_v56  ;;  %v846_v60 = vpop.permute.xlu0 %845 }
0x1234   :  { %v848_v61 = vadd.f32 %v846_v60, %v838_v58 }
0x1235   :  { %1324 = vtanh.f32 %v823_v59 }
0x1236   :  { %1326 = vtanh.f32 %v848_v61 }
0x123f   :  { %v1325_v62 = vpop.eup %1324 }
0x1240   :  { %v1327_v63 = vpop.eup %1326  ;;  %826 = vrot.lane.b32.xlu1 %v1325_v62, %s1451_s12 }
0x1241   :  { %851 = vrot.lane.b32.xlu0 %v1327_v63, %s1451_s12 }
0x12b2   :  { %v827_v0 = vpop.permute.xlu1 %826 }
0x12b3   :  { %v829_v4 = vmul.f32 %v1321_v50, %v827_v0  ;;  %v852_v7 = vpop.permute.xlu0 %851  ;;  %v1037_v0 = vld [vmem:[#allocation7] sm:$0xff] }
0x12b4   :  { %v854_v8 = vmul.f32 %v1323_v52, %v852_v7  ;;  %v1455_v7 = vmov 0.0|0.0  }
0x12b5   :  { %860 = vrot.lane.b32.xlu0 %v829_v4, %s1454_s4  ;;  %v1039_v4 = vld [vmem:[#allocation7 + $0x10] sm:$0xff]  ;;  %1193 = vmatprep.subr.bf16.mxu0 %v1455_v7 }
0x12b6   :  { %856 = vrot.lane.b32.xlu1 %v854_v8, %s1453_s1  ;;  %v1194_v8 = vpack.c.bf16 %v1038_v2, %v1037_v0 }
0x12ba   :  { %132 = vbcast.lane.b32.xlu1 %v130_v9, 256  ;;  %v1040_v9 = vld [vmem:[#allocation7 + $0x18] sm:$0xff] }
0x1327   :  { %v861_v10 = vpop.permute.xlu0 %860 }
0x1328   :  { %v857_v11 = vpop.permute.xlu1 %856 }
0x1329   :  { %v863_v20 = vsel %vm197_vm0, %v857_v11, %v861_v10  ;;  %v1457_v10 = vmov 0.0   ;;  %v1197_v11 = vpack.c.bf16 %v1040_v9, %v1039_v4 }
0x132a   :  { %v864_v12 = vpack.c.bf16 %v863_v20, %v863_v20 }
0x132c   :  { %1170 = vmatmul.mubr.msk.bf16.vlgmr.msra.gmra.mrb[12].mxu0 %vm240_vm1, %v864_v12  ;;  %v133_v13 = vpop.permute.xlu1 %132 }
0x132d   :  { %v147_v1 = vmul.f32 %v1550_v5, %v133_v13  ;;  %1190 = vmatprep.mubr.msk.f32.mxu0 %vm1456_vm2, %v1457_v10  ;;  %1195 = vmatpush3.bf16.msra.mxu0 %v1194_v8 }
0x132e   :  { %1196 = vmatprep.subr.bf16.mxu0 %v1455_v7 }
0x132f   :  { %v161_v14 = vadd.f32 %v1555_v6, %v147_v1 }
0x1331   :  { %1198 = vmatpush3.bf16.msra.mxu0 %v1197_v11 }
0x13ff   :  { %v902_v15 = vpop.f32.mrb[12].mxu0 }
0x1400   :  { %v909_v16 = vadd.f32 %v1619_v39, %v902_v15  ;;  %v904_v17 = vpop.f32.mrb[13].mxu0 }
0x1401   :  { %v934_v18 = vadd.f32 %v904_v17, %v161_v14  ;;  %v906_v19 = vpop.f32.mrb[14].mxu0  ;;  %v1175_v14 = vld [vmem:[%s1834_s6] ss:$0 sm:$0xff] }
0x1402   :  { %1328 = vtanh.f32 %v909_v16  ;;  %v907_v3 = vpop.f32.mrb[15].mxu0  ;;  %v1171_v31 = vmul.f32 -1.442695, %v909_v16 }
0x1403   :  { %1330 = vtanh.f32 %v934_v18  ;;  %v1172_v32 = vmul.f32 -1.442695, %v934_v18 }
0x1404   :  { %1332 = vpow2.f32 %v1171_v31 }
0x1405   :  { %1334 = vpow2.f32 %v1172_v32 }
0x140c   :  { %v1329_v27 = vpop.eup %1328 }
0x140d   :  { %v1331_v30 = vpop.eup %1330  ;;  %919 = vrot.lane.b32.xlu0 %v1329_v27, %s1451_s12 }
0x140e   :  { %944 = vrot.lane.b32.xlu1 %v1331_v30, %s1451_s12  ;;  %v1333_v5 = vpop.eup %1332 }
0x140f   :  { %v1335_v6 = vpop.eup %1334  ;;  %v913_v33 = vadd.f32 1.0, %v1333_v5 }
0x1410   :  { %v938_v34 = vadd.f32 1.0, %v1335_v6 }
0x1411   :  { %1336 = vrcp.f32 %v913_v33 }
0x1412   :  { %1338 = vrcp.f32 %v938_v34 }
0x141b   :  { %v1337_v35 = vpop.eup %1336 }
0x141c   :  { %v1339_v37 = vpop.eup %1338  ;;  %v917_v42 = vmul.f32 %v1337_v35, %v823_v59 }
0x141d   :  { %v942_v21 = vmul.f32 %v1339_v37, %v848_v61 }
0x147f   :  { %v920_v36 = vpop.permute.xlu0 %919 }
0x1480   :  { %v922_v38 = vmul.f32 %v1337_v35, %v920_v36  ;;  %v945_v40 = vpop.permute.xlu1 %944 }
0x1481   :  { %v947_v41 = vmul.f32 %v1339_v37, %v945_v40 }
0x1482   :  { %924 = vrot.lane.b32.xlu0 %v922_v38, %s1451_s12 }
0x1483   :  { %949 = vrot.lane.b32.xlu1 %v947_v41, %s1451_s12 }
0x14f4   :  { %v925_v43 = vpop.permute.xlu0 %924 }
0x14f5   :  { %v927_v29 = vadd.f32 %v925_v43, %v917_v42  ;;  %v950_v44 = vpop.permute.xlu1 %949 }
0x14f6   :  { %v952_v22 = vadd.f32 %v950_v44, %v942_v21 }
0x14f7   :  { %1340 = vtanh.f32 %v927_v29 }
0x14f8   :  { %1342 = vtanh.f32 %v952_v22 }
0x1501   :  { %v1341_v45 = vpop.eup %1340 }
0x1502   :  { %v1343_v23 = vpop.eup %1342  ;;  %930 = vrot.lane.b32.xlu0 %v1341_v45, %s1451_s12 }
0x1503   :  { %955 = vrot.lane.b32.xlu1 %v1343_v23, %s1451_s12 }
0x1574   :  { %v931_v24 = vpop.permute.xlu0 %930 }
0x1575   :  { %v933_v25 = vmul.f32 %v1337_v35, %v931_v24  ;;  %v956_v26 = vpop.permute.xlu1 %955 }
0x1576   :  { %v958_v28 = vmul.f32 %v1339_v37, %v956_v26 }
0x1577   :  { %964 = vrot.lane.b32.xlu1 %v933_v25, %s1454_s4 }
0x1578   :  { %960 = vrot.lane.b32.xlu0 %v958_v28, %s1453_s1 }
0x15e9   :  { %v965_v46 = vpop.permute.xlu1 %964 }
0x15ea   :  { %v961_v47 = vpop.permute.xlu0 %960 }
0x15eb   :  { %v967_v48 = vsel %vm197_vm0, %v961_v47, %v965_v46 }
0x15ec   :  { %v968_v49 = vpack.c.bf16 %v967_v48, %v967_v48 }
0x15ee   :  { %1173 = vmatmul.mubr.msk.bf16.vlgmr.msra.gmra.mrb[12].mxu1 %vm240_vm1, %v968_v49 }
0x16c1   :  { %v1006_v50 = vpop.f32.mrb[12].mxu1 }
0x16c2   :  { %v1012_v51 = vadd.f32 %v1619_v39, %v1006_v50  ;;  %v1008_v52 = vpop.f32.mrb[13].mxu1 }
0x16c3   :  { %v1009_v53 = vpop.f32.mrb[14].mxu1 }
0x16c4   :  { %1344 = vtanh.f32 %v1012_v51  ;;  %v1010_v54 = vpop.f32.mrb[15].mxu1  ;;  %v1174_v56 = vmul.f32 -1.442695, %v1012_v51 }
0x16c6   :  { %1346 = vpow2.f32 %v1174_v56 }
0x16ce   :  { %v1345_v55 = vpop.eup %1344 }
0x16cf   :  { %1022 = vrot.lane.b32.xlu0 %v1345_v55, %s1451_s12 }
0x16d0   :  { %v1347_v57 = vpop.eup %1346 }
0x16d1   :  { %v1016_v58 = vadd.f32 1.0, %v1347_v57 }
0x16d3   :  { %1348 = vrcp.f32 %v1016_v58 }
0x16dd   :  { %v1349_v59 = vpop.eup %1348 }
0x16de   :  { %v1020_v62 = vmul.f32 %v1349_v59, %v927_v29 }
0x1741   :  { %v1023_v60 = vpop.permute.xlu0 %1022 }
0x1742   :  { %v1025_v61 = vmul.f32 %v1349_v59, %v1023_v60 }
0x1744   :  { %1027 = vrot.lane.b32.xlu1 %v1025_v61, %s1451_s12 }
0x17b6   :  { %v1028_v63 = vpop.permute.xlu1 %1027 }
0x17b7   :  { %v1030_v39 = vadd.f32 %v1028_v63, %v1020_v62 }
0x17b9   :  { %1350 = vtanh.f32 %v1030_v39 }
0x17c3   :  { %v1351_v20 = vpop.eup %1350 }
0x17c4   :  { %1033 = vrot.lane.b32.xlu0 %v1351_v20, %s1451_s12 }
0x1836   :  { %v1034_v12 = vpop.permute.xlu0 %1033 }
0x1837   :  { %v1036_v13 = vmul.f32 %v1349_v59, %v1034_v12 }
0x1839   :  { %1049 = vrot.lane.b32.xlu1 %v1036_v13, %s1453_s1 }
0x18ab   :  { %v1050_v1 = vpop.permute.xlu1 %1049 }
0x18ac   :  { %1191 = vmatmul.mubr.msk.f32.vlgmr.msra.gmra.mrb[16].mxu0 %vm197_vm0, %v1050_v1 }
0x197f   :  { %v1119_v15 = vpop.f32.mrb[16].mxu0 }
0x1980   :  { %v1120_v16 = vadd.f32 %v1175_v14, %v1119_v15  ;;  %v1192_v17 = vpop.f32.mrb[17].mxu0 }
0x1982   :  { %1123 = vst [vmem:[#allocation8] sm:$0xff] %v1120_v16 }
0x1983   :  { %1429 = shalt.err (!%p1426_p0)
}
0x1984   :  { %s1430_s3 = scalar_lea.hbm %s1835_s7, 128 }
0x1985   :  { %p1431_p1 = scmp.ne.s32.totalorder %s1835_s7, %s1430_s3  ;;  %p1434_p2 = scmp.lt.u32.totalorder %s1430_s3, %s1835_s7 }
0x1987   :  { %p1436_p3 = pnand %p1434_p2, %p1431_p1 }
0x1989   :  { %1439 = shalt.err (!%p1436_p3)
}
0x198a   :  { %1133 = dma.vmem_to_hbm [thread:$0]  %s1131_s22, 128, %s1835_s7, [#allocation4]  }
0x198b   :  { %1444 = dma.done.wait [#allocation4], 128  }
0x198c   :  { %1445 = vsyncadd [#allocation4], 4294967168 }
0x198d   :  { %1137 = vsyncpa [#allocation3], 1 }
0x198e   :  { %1138 = vsyncpa [#allocation6], 1 }
0x198f   :  { %1139 = vsyncpa [#allocation4], 1 }

</bundles_post_ra>
